<compile_context>
chip_gen: v7x
topology: tpu7x:2x2x1
jax: 0.10.0
libtpu: 0.0.40
codegen_flags: <defaults>
</compile_context>

<pallas_src>
import functools
import math

import jax
import jax.numpy as jnp
from jax import lax
from jax.experimental import pallas as pl
from jax.experimental.pallas import tpu as pltpu


# --------------- fused GroupNorm + QKV + attention + proj_out + residual ---------------
def _attn_block_kernel(x_ref, gmat_ref, gamma_ref, beta_ref, wqkv_ref, bqkv_ref,
                       wp_ref, bp_ref, o_ref, *, num_heads, inv_count, eps, scale):
    # ---- GroupNorm(32, C) over this batch item's T points ----
    x = x_ref[...].astype(jnp.float32)                          # (T, C)
    # Per-channel sums over the T points, then broadcast group statistics back to
    # every channel with a (C, C) 0/1 group-membership matmul (avoids in-kernel
    # lane-dim reshapes / repeats).
    s1 = jnp.sum(x, axis=0, keepdims=True)                      # (1, C)
    s2 = jnp.sum(x * x, axis=0, keepdims=True)                  # (1, C)
    gm = gmat_ref[...]
    mean = jnp.dot(s1, gm, preferred_element_type=jnp.float32) * inv_count
    ex2 = jnp.dot(s2, gm, preferred_element_type=jnp.float32) * inv_count
    var = ex2 - mean * mean
    inv = lax.rsqrt(var + eps)
    xn = (x - mean) * inv * gamma_ref[...] + beta_ref[...]      # (T, C) f32

    # ---- fused QKV projection (1x1 conv == per-point linear) ----
    qkv = jnp.dot(xn.astype(wqkv_ref.dtype), wqkv_ref[...],
                  preferred_element_type=jnp.float32) + bqkv_ref[...]   # (T, 3C)

    T, C = xn.shape
    ch = C // num_heads

    # ---- per-head attention; qkv columns are [q heads | k heads | v heads] ----
    heads = []
    for h in range(num_heads):                                  # static unroll, H small
        q = qkv[:, h * ch:(h + 1) * ch] * scale                 # (T, ch)
        k = qkv[:, C + h * ch:C + (h + 1) * ch] * scale         # (T, ch)
        v = qkv[:, 2 * C + h * ch:2 * C + (h + 1) * ch]         # (T, ch)
        # scores[t, s] = sum_c q[t, c] * k[s, c]   (== torch einsum 'bct,bcs->bts')
        s = lax.dot_general(q, k, (((1,), (1,)), ((), ())),
                            preferred_element_type=jnp.float32)  # (T, T)
        s = s - jnp.max(s, axis=-1, keepdims=True)
        p = jnp.exp(s)
        p = p / jnp.sum(p, axis=-1, keepdims=True)
        heads.append(jnp.dot(p, v, preferred_element_type=jnp.float32))  # (T, ch)
    a = jnp.concatenate(heads, axis=-1)                          # (T, C), head-major

    # ---- output projection + residual with the *normalized* features ----
    hproj = jnp.dot(a.astype(wp_ref.dtype), wp_ref[...],
                    preferred_element_type=jnp.float32) + bp_ref[...]
    o_ref[...] = (xn + hproj).astype(o_ref.dtype)


# ------------------------------ wrappers ------------------------------
def prepare_params(w_qkv, b_qkv, w_proj, b_proj, gamma, beta, *,
                   num_heads, num_groups):
    """One-time layout prep (kept OUT of the jitted per-call path).

    torch Conv1d qkv weight is [3C, C] with legacy head-major channel order
    (q_h, k_h, v_h per head).  Re-order the output channels to
    [q all heads | k all heads | v all heads] so the kernel can slice heads as
    128-aligned lane blocks, and pre-transpose so the kernel does plain
    [T, C] @ [C, N] matmuls.
    """
    c = w_qkv.shape[1]
    ch = c // num_heads
    w = w_qkv.reshape(num_heads, 3, ch, c)                      # [h, part, j, c]
    w = jnp.transpose(w, (1, 0, 2, 3)).reshape(3 * c, c)        # [part, h, j] major
    wqkv = jnp.asarray(w.T)                                     # [C, 3C]
    bqkv = jnp.transpose(b_qkv.reshape(num_heads, 3, ch), (1, 0, 2)).reshape(1, 3 * c)
    wproj = jnp.asarray(w_proj.T)                               # [C, C] (in, out)
    bproj = b_proj.reshape(1, c)
    # 0/1 group-membership matrix for the GroupNorm statistics
    cpg = c // num_groups
    gid = jnp.arange(c) // cpg
    gmat = (gid[:, None] == gid[None, :]).astype(jnp.float32)
    return (gmat, gamma.reshape(1, c), beta.reshape(1, c),
            wqkv, bqkv, wproj, bproj)


@functools.partial(jax.jit, static_argnames=("num_heads", "num_groups", "eps"))
def attention_block_forward(x, gmat, gamma, beta, wqkv, bqkv, wproj, bproj, *,
                            num_heads, num_groups=32, eps=1e-5):
    B, T, C = x.shape
    H = num_heads
    assert C % H == 0 and C % num_groups == 0
    ch = C // H
    cpg = C // num_groups
    # TODO(synk): support ch % 128 != 0 by packing several heads per lane block.
    assert ch % 128 == 0, "per-head channels must be a multiple of 128 lanes"
    assert T % 8 == 0, "points-per-batch must be a multiple of 8 sublanes"

    scale = 1.0 / math.sqrt(math.sqrt(ch))
    kern = functools.partial(_attn_block_kernel,
                             num_heads=H,
                             inv_count=1.0 / float(T * cpg),
                             eps=float(eps),
                             scale=scale)

    out = pl.pallas_call(
        kern,
        out_shape=jax.ShapeDtypeStruct((B, T, C), x.dtype),
        grid_spec=pltpu.PrefetchScalarGridSpec(
            num_scalar_prefetch=0,
            grid=(B,),
            in_specs=[
                pl.BlockSpec((None, T, C), lambda b: (b, 0, 0)),   # x (per batch item)
                pl.BlockSpec((C, C), lambda b: (0, 0)),            # group mask
                pl.BlockSpec((1, C), lambda b: (0, 0)),            # gamma
                pl.BlockSpec((1, C), lambda b: (0, 0)),            # beta
                pl.BlockSpec((C, 3 * C), lambda b: (0, 0)),        # W_qkv
                pl.BlockSpec((1, 3 * C), lambda b: (0, 0)),        # b_qkv
                pl.BlockSpec((C, C), lambda b: (0, 0)),            # W_proj
                pl.BlockSpec((1, C), lambda b: (0, 0)),            # b_proj
            ],
            out_specs=pl.BlockSpec((None, T, C), lambda b: (b, 0, 0)),
        ),
        compiler_params=pltpu.CompilerParams(
            dimension_semantics=("parallel",)),
    )(x, gmat, gamma, beta, wqkv, bqkv, wproj, bproj)

    return out


# ------------------------------ pure-JAX reference ------------------------------
def attention_block_ref(x, gamma, beta, w_qkv, b_qkv, w_proj, b_proj, *,
                        num_heads, num_groups=32, eps=1e-5):
    hp = jax.lax.Precision.HIGHEST
    B, T, C = x.shape
    cpg = C // num_groups
    xg = x.reshape(B, T, num_groups, cpg)
    mean = xg.mean(axis=(1, 3), keepdims=True)
    var = xg.var(axis=(1, 3), keepdims=True)
    xn = ((xg - mean) / jnp.sqrt(var + eps)).reshape(B, T, C)
    xn = xn * gamma + beta
    qkv = jnp.matmul(xn, w_qkv.T, precision=hp) + b_qkv          # (B, T, 3C) legacy order
    ch = C // num_heads
    scale = 1.0 / math.sqrt(math.sqrt(ch))
    qkv = qkv.reshape(B, T, num_heads, 3, ch)
    q, k, v = qkv[..., 0, :], qkv[..., 1, :], qkv[..., 2, :]
    s = jnp.einsum('bthc,bshc->bhts', q * scale, k * scale, precision=hp)
    p = jax.nn.softmax(s.astype(jnp.float32), axis=-1).astype(s.dtype)
    a = jnp.einsum('bhts,bshc->bthc', p, v, precision=hp).reshape(B, T, C)
    h = jnp.matmul(a, w_proj.T, precision=hp) + b_proj
    return xn + h


if __name__ == "__main__":
    key = jax.random.PRNGKey(0)
    ks = jax.random.split(key, 7)

    # Small shapes consistent with the module: B batch items of T points each,
    # C channels.  GroupNorm(32, C) needs C % 32 == 0; head dim 128 keeps every
    # lane block 128-aligned.
    B, T, C = 2, 64, 256
    num_heads = 2          # -> 128 channels per head
    num_groups = 32

    x = jax.random.normal(ks[0], (B, T, C), dtype=jnp.float32)
    gamma = 1.0 + 0.1 * jax.random.normal(ks[1], (C,), dtype=jnp.float32)
    beta = 0.1 * jax.random.normal(ks[2], (C,), dtype=jnp.float32)
    bound = 1.0 / math.sqrt(C)
    w_qkv = jax.random.uniform(ks[3], (3 * C, C), minval=-bound, maxval=bound,
                               dtype=jnp.float32)
    b_qkv = jax.random.uniform(ks[4], (3 * C,), minval=-bound, maxval=bound,
                               dtype=jnp.float32)
    w_proj = jax.random.uniform(ks[5], (C, C), minval=-bound, maxval=bound,
                                dtype=jnp.float32)
    b_proj = jax.random.uniform(ks[6], (C,), minval=-bound, maxval=bound,
                                dtype=jnp.float32)

    params = prepare_params(w_qkv, b_qkv, w_proj, b_proj, gamma, beta,
                            num_heads=num_heads, num_groups=num_groups)

    out = attention_block_forward(x, *params, num_heads=num_heads,
                                  num_groups=num_groups)
    jax.block_until_ready(out)

    expected = attention_block_ref(x, gamma, beta, w_qkv, b_qkv, w_proj, b_proj,
                                   num_heads=num_heads, num_groups=num_groups)
    assert out.shape == (B, T, C)
    max_err = float(jnp.max(jnp.abs(out - expected)))
    assert jnp.allclose(out, expected, atol=5e-3, rtol=5e-3), max_err
    print("KERNEL_OK")
</pallas_src>

<mosaic_0001>
module attributes {stable_mosaic.version = 11 : i64} {
  func.func @_attn_block_kernel(%arg0: i32, %arg1: memref<1x64x256xf32, #tpu.memory_space<vmem>>, %arg2: memref<256x256xf32, #tpu.memory_space<vmem>>, %arg3: memref<1x256xf32, #tpu.memory_space<vmem>>, %arg4: memref<1x256xf32, #tpu.memory_space<vmem>>, %arg5: memref<256x768xf32, #tpu.memory_space<vmem>>, %arg6: memref<1x768xf32, #tpu.memory_space<vmem>>, %arg7: memref<256x256xf32, #tpu.memory_space<vmem>>, %arg8: memref<1x256xf32, #tpu.memory_space<vmem>>, %arg9: memref<1x64x256xf32, #tpu.memory_space<vmem>>) attributes {dimension_semantics = [#tpu.dimension_semantics<parallel>], iteration_bounds = array<i64: 2>, scalar_prefetch = 0 : i64, scratch_operands = 0 : i64, tpu.core_type = #tpu.core_type<tc>, window_params = [{transform_indices = @transform_0, window_bounds = array<i64: 1, 64, 256>}, {pipeline_mode = #tpu.pipeline_mode<synchronous>, transform_indices = @transform_1, window_bounds = array<i64: 256, 256>}, {pipeline_mode = #tpu.pipeline_mode<synchronous>, transform_indices = @transform_2, window_bounds = array<i64: 1, 256>}, {pipeline_mode = #tpu.pipeline_mode<synchronous>, transform_indices = @transform_3, window_bounds = array<i64: 1, 256>}, {pipeline_mode = #tpu.pipeline_mode<synchronous>, transform_indices = @transform_4, window_bounds = array<i64: 256, 768>}, {pipeline_mode = #tpu.pipeline_mode<synchronous>, transform_indices = @transform_5, window_bounds = array<i64: 1, 768>}, {pipeline_mode = #tpu.pipeline_mode<synchronous>, transform_indices = @transform_6, window_bounds = array<i64: 256, 256>}, {pipeline_mode = #tpu.pipeline_mode<synchronous>, transform_indices = @transform_7, window_bounds = array<i64: 1, 256>}, {transform_indices = @transform_8, window_bounds = array<i64: 1, 64, 256>}]} {
    %c0 = arith.constant 0 : index
    %c0_0 = arith.constant 0 : index
    %c0_1 = arith.constant 0 : index
    %0 = vector.load %arg1[%c0, %c0_0, %c0_1] : memref<1x64x256xf32, #tpu.memory_space<vmem>>, vector<1x64x256xf32>
    %1 = vector.shape_cast %0 : vector<1x64x256xf32> to vector<64x256xf32>
    %cst = arith.constant dense<0.000000e+00> : vector<256xf32>
    %2 = vector.multi_reduction <add>, %1, %cst [0] : vector<64x256xf32> to vector<256xf32>
    %3 = vector.shape_cast %2 : vector<256xf32> to vector<1x256xf32>
    %4 = arith.mulf %1, %1 : vector<64x256xf32>
    %cst_2 = arith.constant dense<0.000000e+00> : vector<256xf32>
    %5 = vector.multi_reduction <add>, %4, %cst_2 [0] : vector<64x256xf32> to vector<256xf32>
    %6 = vector.shape_cast %5 : vector<256xf32> to vector<1x256xf32>
    %c0_3 = arith.constant 0 : index
    %c0_4 = arith.constant 0 : index
    %7 = vector.load %arg2[%c0_3, %c0_4] : memref<256x256xf32, #tpu.memory_space<vmem>>, vector<256x256xf32>
    %cst_5 = arith.constant dense<0.000000e+00> : vector<1x256xf32>
    %8 = tpu.matmul %3, %7, %cst_5 {dimension_numbers = #tpu.dot_dimension_numbers<[1], [0], [0], [1], [0, 0, 1, 1], [], []>} : vector<1x256xf32>, vector<256x256xf32>, vector<1x256xf32> -> vector<1x256xf32>
    %cst_6 = arith.constant 0.001953125 : f32
    %9 = vector.broadcast %cst_6 : f32 to vector<1x256xf32>
    %10 = arith.mulf %8, %9 : vector<1x256xf32>
    %cst_7 = arith.constant dense<0.000000e+00> : vector<1x256xf32>
    %11 = tpu.matmul %6, %7, %cst_7 {dimension_numbers = #tpu.dot_dimension_numbers<[1], [0], [0], [1], [0, 0, 1, 1], [], []>} : vector<1x256xf32>, vector<256x256xf32>, vector<1x256xf32> -> vector<1x256xf32>
    %cst_8 = arith.constant 0.001953125 : f32
    %12 = vector.broadcast %cst_8 : f32 to vector<1x256xf32>
    %13 = arith.mulf %11, %12 : vector<1x256xf32>
    %14 = arith.mulf %10, %10 : vector<1x256xf32>
    %15 = arith.subf %13, %14 : vector<1x256xf32>
    %cst_9 = arith.constant 9.99999974E-6 : f32
    %16 = vector.broadcast %cst_9 : f32 to vector<1x256xf32>
    %17 = arith.addf %15, %16 : vector<1x256xf32>
    %18 = math.rsqrt %17 : vector<1x256xf32>
    %19 = vector.broadcast %10 : vector<1x256xf32> to vector<64x256xf32>
    %20 = arith.subf %1, %19 : vector<64x256xf32>
    %21 = vector.broadcast %18 : vector<1x256xf32> to vector<64x256xf32>
    %22 = arith.mulf %20, %21 : vector<64x256xf32>
    %c0_10 = arith.constant 0 : index
    %c0_11 = arith.constant 0 : index
    %23 = vector.load %arg3[%c0_10, %c0_11] : memref<1x256xf32, #tpu.memory_space<vmem>>, vector<1x256xf32>
    %24 = vector.broadcast %23 : vector<1x256xf32> to vector<64x256xf32>
    %25 = arith.mulf %22, %24 : vector<64x256xf32>
    %c0_12 = arith.constant 0 : index
    %c0_13 = arith.constant 0 : index
    %26 = vector.load %arg4[%c0_12, %c0_13] : memref<1x256xf32, #tpu.memory_space<vmem>>, vector<1x256xf32>
    %27 = vector.broadcast %26 : vector<1x256xf32> to vector<64x256xf32>
    %28 = arith.addf %25, %27 : vector<64x256xf32>
    %c0_14 = arith.constant 0 : index
    %c0_15 = arith.constant 0 : index
    %29 = vector.load %arg5[%c0_14, %c0_15] : memref<256x768xf32, #tpu.memory_space<vmem>>, vector<256x768xf32>
    %cst_16 = arith.constant dense<0.000000e+00> : vector<64x768xf32>
    %30 = tpu.matmul %28, %29, %cst_16 {dimension_numbers = #tpu.dot_dimension_numbers<[1], [0], [0], [1], [0, 0, 1, 1], [], []>} : vector<64x256xf32>, vector<256x768xf32>, vector<64x768xf32> -> vector<64x768xf32>
    %c0_17 = arith.constant 0 : index
    %c0_18 = arith.constant 0 : index
    %31 = vector.load %arg6[%c0_17, %c0_18] : memref<1x768xf32, #tpu.memory_space<vmem>>, vector<1x768xf32>
    %32 = vector.broadcast %31 : vector<1x768xf32> to vector<64x768xf32>
    %33 = arith.addf %30, %32 : vector<64x768xf32>
    %34 = vector.extract_strided_slice %33 {offsets = [0, 0], sizes = [64, 128], strides = [1, 1]} : vector<64x768xf32> to vector<64x128xf32>
    %cst_19 = arith.constant 0.297301769 : f32
    %35 = vector.broadcast %cst_19 : f32 to vector<64x128xf32>
    %36 = arith.mulf %34, %35 : vector<64x128xf32>
    %37 = vector.extract_strided_slice %33 {offsets = [0, 256], sizes = [64, 128], strides = [1, 1]} : vector<64x768xf32> to vector<64x128xf32>
    %cst_20 = arith.constant 0.297301769 : f32
    %38 = vector.broadcast %cst_20 : f32 to vector<64x128xf32>
    %39 = arith.mulf %37, %38 : vector<64x128xf32>
    %40 = vector.extract_strided_slice %33 {offsets = [0, 512], sizes = [64, 128], strides = [1, 1]} : vector<64x768xf32> to vector<64x128xf32>
    %cst_21 = arith.constant dense<0.000000e+00> : vector<64x64xf32>
    %41 = tpu.matmul %36, %39, %cst_21 {dimension_numbers = #tpu.dot_dimension_numbers<[1], [1], [0], [0], [0, 0, 1, 0], [], []>} : vector<64x128xf32>, vector<64x128xf32>, vector<64x64xf32> -> vector<64x64xf32>
    %cst_22 = arith.constant dense<0xFF800000> : vector<64xf32>
    %42 = vector.multi_reduction <maximumf>, %41, %cst_22 [1] : vector<64x64xf32> to vector<64xf32>
    %43 = vector.shape_cast %42 : vector<64xf32> to vector<64x1xf32>
    %44 = vector.broadcast %43 : vector<64x1xf32> to vector<64x64xf32>
    %45 = arith.subf %41, %44 : vector<64x64xf32>
    %46 = math.exp %45 : vector<64x64xf32>
    %cst_23 = arith.constant dense<0.000000e+00> : vector<64xf32>
    %47 = vector.multi_reduction <add>, %46, %cst_23 [1] : vector<64x64xf32> to vector<64xf32>
    %48 = vector.shape_cast %47 : vector<64xf32> to vector<64x1xf32>
    %49 = vector.broadcast %48 : vector<64x1xf32> to vector<64x64xf32>
    %50 = arith.divf %46, %49 : vector<64x64xf32>
    %cst_24 = arith.constant dense<0.000000e+00> : vector<64x128xf32>
    %51 = tpu.matmul %50, %40, %cst_24 {dimension_numbers = #tpu.dot_dimension_numbers<[1], [0], [0], [1], [0, 0, 1, 1], [], []>} : vector<64x64xf32>, vector<64x128xf32>, vector<64x128xf32> -> vector<64x128xf32>
    %52 = vector.extract_strided_slice %33 {offsets = [0, 128], sizes = [64, 128], strides = [1, 1]} : vector<64x768xf32> to vector<64x128xf32>
    %cst_25 = arith.constant 0.297301769 : f32
    %53 = vector.broadcast %cst_25 : f32 to vector<64x128xf32>
    %54 = arith.mulf %52, %53 : vector<64x128xf32>
    %55 = vector.extract_strided_slice %33 {offsets = [0, 384], sizes = [64, 128], strides = [1, 1]} : vector<64x768xf32> to vector<64x128xf32>
    %cst_26 = arith.constant 0.297301769 : f32
    %56 = vector.broadcast %cst_26 : f32 to vector<64x128xf32>
    %57 = arith.mulf %55, %56 : vector<64x128xf32>
    %58 = vector.extract_strided_slice %33 {offsets = [0, 640], sizes = [64, 128], strides = [1, 1]} : vector<64x768xf32> to vector<64x128xf32>
    %cst_27 = arith.constant dense<0.000000e+00> : vector<64x64xf32>
    %59 = tpu.matmul %54, %57, %cst_27 {dimension_numbers = #tpu.dot_dimension_numbers<[1], [1], [0], [0], [0, 0, 1, 0], [], []>} : vector<64x128xf32>, vector<64x128xf32>, vector<64x64xf32> -> vector<64x64xf32>
    %cst_28 = arith.constant dense<0xFF800000> : vector<64xf32>
    %60 = vector.multi_reduction <maximumf>, %59, %cst_28 [1] : vector<64x64xf32> to vector<64xf32>
    %61 = vector.shape_cast %60 : vector<64xf32> to vector<64x1xf32>
    %62 = vector.broadcast %61 : vector<64x1xf32> to vector<64x64xf32>
    %63 = arith.subf %59, %62 : vector<64x64xf32>
    %64 = math.exp %63 : vector<64x64xf32>
    %cst_29 = arith.constant dense<0.000000e+00> : vector<64xf32>
    %65 = vector.multi_reduction <add>, %64, %cst_29 [1] : vector<64x64xf32> to vector<64xf32>
    %66 = vector.shape_cast %65 : vector<64xf32> to vector<64x1xf32>
    %67 = vector.broadcast %66 : vector<64x1xf32> to vector<64x64xf32>
    %68 = arith.divf %64, %67 : vector<64x64xf32>
    %cst_30 = arith.constant dense<0.000000e+00> : vector<64x128xf32>
    %69 = tpu.matmul %68, %58, %cst_30 {dimension_numbers = #tpu.dot_dimension_numbers<[1], [0], [0], [1], [0, 0, 1, 1], [], []>} : vector<64x64xf32>, vector<64x128xf32>, vector<64x128xf32> -> vector<64x128xf32>
    %70 = tpu.concatenate %51, %69 in 1 : vector<64x128xf32>, vector<64x128xf32> -> vector<64x256xf32>
    %c0_31 = arith.constant 0 : index
    %c0_32 = arith.constant 0 : index
    %71 = vector.load %arg7[%c0_31, %c0_32] : memref<256x256xf32, #tpu.memory_space<vmem>>, vector<256x256xf32>
    %cst_33 = arith.constant dense<0.000000e+00> : vector<64x256xf32>
    %72 = tpu.matmul %70, %71, %cst_33 {dimension_numbers = #tpu.dot_dimension_numbers<[1], [0], [0], [1], [0, 0, 1, 1], [], []>} : vector<64x256xf32>, vector<256x256xf32>, vector<64x256xf32> -> vector<64x256xf32>
    %c0_34 = arith.constant 0 : index
    %c0_35 = arith.constant 0 : index
    %73 = vector.load %arg8[%c0_34, %c0_35] : memref<1x256xf32, #tpu.memory_space<vmem>>, vector<1x256xf32>
    %74 = vector.broadcast %73 : vector<1x256xf32> to vector<64x256xf32>
    %75 = arith.addf %72, %74 : vector<64x256xf32>
    %76 = arith.addf %28, %75 : vector<64x256xf32>
    %c0_36 = arith.constant 0 : index
    %c0_37 = arith.constant 0 : index
    %c0_38 = arith.constant 0 : index
    %77 = vector.load %arg9[%c0_36, %c0_37, %c0_38] : memref<1x64x256xf32, #tpu.memory_space<vmem>>, vector<1x64x256xf32>
    %78 = vector.shape_cast %77 : vector<1x64x256xf32> to vector<64x256xf32>
    %79 = vector.shape_cast %76 : vector<64x256xf32> to vector<1x64x256xf32>
    tpu.vector_store %arg9[%c0_36, %c0_37, %c0_38], %79 {strides = array<i32>} : memref<1x64x256xf32, #tpu.memory_space<vmem>>, vector<1x64x256xf32>,
    return
  }
  func.func @transform_0(%arg0: i32) -> (i32, i32, i32) {
    %c0_i32 = arith.constant 0 : i32
    %c0_i32_0 = arith.constant 0 : i32
    %c0_i32_1 = arith.constant 0 : i32
    return %arg0, %c0_i32, %c0_i32_0 : i32, i32, i32
  }
  func.func @transform_1(%arg0: i32) -> (i32, i32) {
    %c0_i32 = arith.constant 0 : i32
    %c0_i32_0 = arith.constant 0 : i32
    %c0_i32_1 = arith.constant 0 : i32
    return %c0_i32, %c0_i32_0 : i32, i32
  }
  func.func @transform_2(%arg0: i32) -> (i32, i32) {
    %c0_i32 = arith.constant 0 : i32
    %c0_i32_0 = arith.constant 0 : i32
    %c0_i32_1 = arith.constant 0 : i32
    return %c0_i32, %c0_i32_0 : i32, i32
  }
  func.func @transform_3(%arg0: i32) -> (i32, i32) {
    %c0_i32 = arith.constant 0 : i32
    %c0_i32_0 = arith.constant 0 : i32
    %c0_i32_1 = arith.constant 0 : i32
    return %c0_i32, %c0_i32_0 : i32, i32
  }
  func.func @transform_4(%arg0: i32) -> (i32, i32) {
    %c0_i32 = arith.constant 0 : i32
    %c0_i32_0 = arith.constant 0 : i32
    %c0_i32_1 = arith.constant 0 : i32
    return %c0_i32, %c0_i32_0 : i32, i32
  }
  func.func @transform_5(%arg0: i32) -> (i32, i32) {
    %c0_i32 = arith.constant 0 : i32
    %c0_i32_0 = arith.constant 0 : i32
    %c0_i32_1 = arith.constant 0 : i32
    return %c0_i32, %c0_i32_0 : i32, i32
  }
  func.func @transform_6(%arg0: i32) -> (i32, i32) {
    %c0_i32 = arith.constant 0 : i32
    %c0_i32_0 = arith.constant 0 : i32
    %c0_i32_1 = arith.constant 0 : i32
    return %c0_i32, %c0_i32_0 : i32, i32
  }
  func.func @transform_7(%arg0: i32) -> (i32, i32) {
    %c0_i32 = arith.constant 0 : i32
    %c0_i32_0 = arith.constant 0 : i32
    %c0_i32_1 = arith.constant 0 : i32
    return %c0_i32, %c0_i32_0 : i32, i32
  }
  func.func @transform_8(%arg0: i32) -> (i32, i32, i32) {
    %c0_i32 = arith.constant 0 : i32
    %c0_i32_0 = arith.constant 0 : i32
    %c0_i32_1 = arith.constant 0 : i32
    return %arg0, %c0_i32, %c0_i32_0 : i32, i32, i32
  }
}

</mosaic_0001>

<bundles_post_ra>
// kernel: attention_block_forward.1
= control target key start
LH: loop header
LB: loop body
LE: loop exit
PB: predicated region body
PF: predicated region fallthrough
CT: control target
= control target key end

     0   :  { %s4247_s0 = inlined_call_operand.hbm [shape: f32[2,64,256], index: 0, kind: input, shape index: {}]   ;;  %s4248_s1 = inlined_call_operand.hbm [shape: f32[256,256], index: 1, kind: input, shape index: {}]   ;;  %s4249_s2 = inlined_call_operand.vmem [shape: f32[1,256], index: 2, kind: input, shape index: {}]   ;;  %s4250_s3 = inlined_call_operand.vmem [shape: f32[1,256], index: 3, kind: input, shape index: {}]   ;;  %s4251_s4 = inlined_call_operand.hbm [shape: f32[256,768], index: 4, kind: input, shape index: {}]   ;;  %s4252_s5 = inlined_call_operand.vmem [shape: f32[1,768], index: 5, kind: input, shape index: {}]   ;;  %s4253_s6 = inlined_call_operand.hbm [shape: f32[256,256], index: 6, kind: input, shape index: {}]   ;;  %s4254_s7 = inlined_call_operand.vmem [shape: f32[1,256], index: 7, kind: input, shape index: {}]   ;;  %s4255_s8 = inlined_call_operand.hbm [shape: f32[2,64,256], index: 8, kind: output, shape index: {}]  }
   0x1   :  { %4265 = sst [smem:[#allocation17_spill]] %s4248_s1 }
   0x2   :  { %13 = vsyncpa [#allocation3], 0 }
   0x3   :  { %15 = vsyncpa [#allocation3 + $0x1], 0 }
   0x4   :  { %16 = vsyncpa [#allocation6], 0 }
   0x5   :  { %17 = vsyncpa [#allocation9], 0 }
   0x6   :  { %18 = vsyncpa [#allocation4], 0 }
   0x7   :  { %20 = vsyncpa [#allocation4 + $0x1], 0  ;;  %s3410_s27 = smov 0   ;;  %s3412_s28 = smov 0  }
   0x8   :  { %s3414_s29 = smov 0   ;;  %s3416_s30 = smov 0  }
   0x9 LB: > { %4266 = sst [smem:[#allocation15_spill]] %s3340_s27  ;;  %s3431_s9 = sadd.s32 4294967295, %s3352_s30   ;;  %s3352_s30 = sphi %s3416_s30, %s4292_s30   ;;  %s3348_s29 = sphi %s3414_s29, %s4291_s29   ;;  %s3344_s28 = sphi %s3412_s28, %s4290_s28   ;;  %s3340_s27 = sphi %s3410_s27, %s4289_s27  }
   0xa   : > { %s2351_s10 = sadd.s32 4294967294, %s3352_s30   ;;  %p46_p0 = scmp.ne.s32.totalorder %s3344_s28, %s3340_s27 }
   0xb   : > { %p4256_p1 = scmp.eq.s32.totalorder %s3431_s9, 0  ;;  %p223_p3 = scmp.eq.s32.totalorder %s2351_s10, 1 }
   0xc   : > { %p2352_p5 = scmp.ge.s32.totalorder %s3352_s30, 1  ;;  %p230_p7 = scmp.lt.s32.totalorder %s3352_s30, 3 }
   0xd   : > { %p3440_p4 = por %p4256_p1, %p46_p0  ;;  %p3445_p6 = por %p223_p3, %p46_p0 }
   0xe   : > { %p3450_p8 = pnand %p2352_p5, %p230_p7  ;;  %s3354_s14 = smov [#allocation5]  }
   0xf   : > { %s4267_s11 = scalar_select %p3440_p4, 1, 0 }
  0x10   : > { %s4268_s12 = scalar_select %p3445_p6, 1, 0 }
  0x11   : > { %s4270_s13 = scalar_select %p3450_p8, 1, 0 }
  0x12   : > { %4269 = sst [smem:[#allocation16_spill]] %s4268_s12  ;;  %s242_s15 = sshll.u32 %s3354_s14, 4  ;;  %s3454_s15 = int_to_ptr.vmem [resolvable:$true] %s242_s15 }
  0x13   : > { %p3029_p9 = pneg %p3450_p8  ;;  %s3355_s17 = smov [#allocation7]  }
  0x14   : > { %s261_s18 = sshll.u32 %s3355_s17, 4  ;;  %s4272_s1 = sld [smem:[#allocation17_spill]]  ;;  %s3465_s18 = int_to_ptr.vmem [resolvable:$true] %s261_s18 }
  0x15   : > { %p3461_p11 = pnand %p3029_p9, %p4256_p1 }
  0x17   : > { %p3475_p13 = pneg %p3461_p11 }
  0x1a   : > { %s3164_s21 = scalar_lea.hbm %s4272_s1, 8192 }
  0x1b   : > { %p3165_p12 = scmp.ne.s32.totalorder %s4272_s1, %s3164_s21  ;;  %p3171_p5 = scmp.lt.u32.totalorder %s3164_s21, %s4272_s1 }
  0x1d   : > { %p3167_p0 = pnand %p3475_p13, %p3165_p12 }
  0x1f   : > { %p3168_p3 = pneg %p3167_p0 }
  0x21   : > { %p3173_p7 = pnand %p3171_p5, %p3168_p3 }
  0x23   : > { %3176 = shalt.err (!%p3173_p7)
}
  0x24   : > { %s3177_s10 = scalar_lea.vmem %s3454_s15, 8192  ;;  %p3185_p2 = scmp.lt.s32.totalorder %s3454_s15, %s3454_s15 }
  0x25   : > { %p3178_p9 = scmp.ne.s32.totalorder %s3454_s15, %s3177_s10  ;;  %p3186_p6 = scmp.lt.s32.totalorder %s3177_s10, %s3177_s10 }
  0x27   : > { %p3180_p10 = pnand %p3178_p9, %p3475_p13  ;;  %p3187_p12 = por %p3186_p6, %p3185_p2 }
  0x29   : > { %p3181_p1 = pneg %p3180_p10 }
  0x2b   : > { %p3188_p0 = pnand %p3187_p12, %p3181_p1 }
  0x2d   : > { %3191 = shalt.err (!%p3188_p0)
}
  0x2e   : > { %s4258_s14 = smov 256   ;;  %s4260_s17 = smov 16  }
  0x2f   : > { %3032 = dma.hbm_to_vmem [thread:$0]  (!%p3461_p11), %s4272_s1, 8192, %s3454_s15, [#allocation6], %s4258_s14, %s4258_s14, %s4260_s17  }
  0x30   : > { %s3192_s23 = scalar_lea.hbm %s4251_s4, 24576 }
  0x31   : > { %p3193_p1 = scmp.ne.s32.totalorder %s4251_s4, %s3192_s23  ;;  %p3199_p10 = scmp.lt.u32.totalorder %s3192_s23, %s4251_s4 }
  0x33   : > { %p3195_p2 = pnand %p3193_p1, %p3475_p13 }
  0x35   : > { %p3196_p6 = pneg %p3195_p2 }
  0x37   : > { %p3201_p3 = pnand %p3199_p10, %p3196_p6 }
  0x39   : > { %3204 = shalt.err (!%p3201_p3)
}
  0x3a   : > { %s3205_s15 = scalar_lea.vmem %s3465_s18, 24576  ;;  %p3213_p12 = scmp.lt.s32.totalorder %s3465_s18, %s3465_s18 }
  0x3b   : > { %p3206_p5 = scmp.ne.s32.totalorder %s3465_s18, %s3205_s15  ;;  %p3214_p0 = scmp.lt.s32.totalorder %s3205_s15, %s3205_s15 }
  0x3d   : > { %p3208_p7 = pnand %p3206_p5, %p3475_p13  ;;  %p3215_p1 = por %p3214_p0, %p3213_p12 }
  0x3f   : > { %p3209_p9 = pneg %p3208_p7 }
  0x41   : > { %p3216_p2 = pnand %p3215_p1, %p3209_p9 }
  0x43   : > { %3219 = shalt.err (!%p3216_p2)
}
  0x44   : > { %s3358_s19 = smov 768   ;;  %s3359_s12 = smov 48  }
  0x45   : > { %3035 = dma.hbm_to_vmem [thread:$0]  (!%p3461_p11), %s4251_s4, 24576, %s3465_s18, [#allocation6], %s3358_s19, %s3358_s19, %s3359_s12  }
  0x46   : > { %s3360_s22 = smov [#allocation8]   ;;  %s3523_s25 = sadd.s32 1, %s3352_s30  }
  0x47   : > { %s277_s23 = sshll.u32 %s3360_s22, 4  ;;  %s3220_s15 = scalar_lea.hbm %s4253_s6, 8192  ;;  %s278_s23 = int_to_ptr.vmem [resolvable:$true] %s277_s23 }
  0x48   : > { %p3221_p6 = scmp.ne.s32.totalorder %s4253_s6, %s3220_s15  ;;  %p3227_p5 = scmp.lt.u32.totalorder %s3220_s15, %s4253_s6 }
  0x4a   : > { %p3223_p10 = pnand %p3221_p6, %p3475_p13 }
  0x4c   : > { %p3224_p3 = pneg %p3223_p10 }
  0x4e   : > { %p3229_p7 = pnand %p3227_p5, %p3224_p3 }
  0x50   : > { %3232 = shalt.err (!%p3229_p7)
}
  0x51   : > { %s3233_s18 = scalar_lea.vmem %s278_s23, 8192  ;;  %p3241_p1 = scmp.lt.s32.totalorder %s278_s23, %s278_s23 }
  0x52   : > { %p3234_p9 = scmp.ne.s32.totalorder %s278_s23, %s3233_s18  ;;  %p3242_p2 = scmp.lt.s32.totalorder %s3233_s18, %s3233_s18 }
  0x54   : > { %p3236_p12 = pnand %p3234_p9, %p3475_p13  ;;  %p3243_p4 = por %p3242_p2, %p3241_p1 }
  0x56   : > { %p3237_p0 = pneg %p3236_p12 }
  0x58   : > { %p3244_p8 = pnand %p3243_p4, %p3237_p0 }
  0x5a   : > { %3247 = shalt.err (!%p3244_p8)
}
  0x5b   : > { %s4274_s14 = smov 16   ;;  %s4275_s17 = smov 256  }
  0x5c   : > { %3038 = dma.hbm_to_vmem [thread:$0]  (!%p3461_p11), %s4253_s6, 8192, %s278_s23, [#allocation9], %s4275_s17, %s4275_s17, %s4274_s14  }
  0x5d   : > { %s30_s24 = ssub.s32 %s3352_s30, %s3523_s25  ;;  %s33_s16 = sadd.s32 1, %s3348_s29 }
  0x5e   : > { %p31_p4 = scmp.eq.s32.totalorder %s30_s24, 0  ;;  %p40_p8 = scmp.ne.s32.totalorder %s3348_s29, %s3344_s28 }
  0x5f   : > { %p41_p13 = scmp.eq.s32.totalorder %s3352_s30, 0  ;;  %p3050_p6 = scmp.lt.s32.totalorder %s3352_s30, 2 }
  0x60   : > { %s3554_s19 = scalar_select %p31_p4, %s3348_s29, %s33_s16  }
  0x61   : > { %p42_p10 = por %p41_p13, %p40_p8  ;;  %p4276_p3 = scmp.eq.s32.totalorder %s3431_s9, 1 }
  0x62   : > { %s294_s20 = sand.u32 1, %s3348_s29   ;;  %s2387_s21 = sshll.u32 %s3352_s30, 11 }
  0x63   : > { %p3558_p5 = por %p4276_p3, %p40_p8  ;;  %s2357_s22 = sshll.u32 %s294_s20, 7 }
  0x64   : > { %s3567_s23 = scalar_lea.hbm %s4247_s0, %s2387_s21  ;;  %s298_s15 = scalar_lea.vmem [#allocation2], %s2357_s22 }
  0x65   : > { %s305_s18 = sshll.u32 %s298_s15, 4  ;;  %p3569_p11 = pnand %p3050_p6, %p42_p10  ;;  %s3573_s18 = int_to_ptr.vmem [resolvable:$true] %s305_s18 }
  0x66   : > { %s3575_s27 = scalar_lea.sflag [#allocation3], %s294_s20  ;;  %s3248_s24 = scalar_lea.hbm %s3567_s23, 2048 }
  0x67   : > { %p3249_p7 = scmp.ne.s32.totalorder %s3567_s23, %s3248_s24  ;;  %p3250_p9 = pneg %p3569_p11 }
  0x68   : > { %s3253_s22 = scalar_lea.hbm %s4247_s0, 4096  ;;  %p3254_p1 = scmp.lt.u32.totalorder %s3567_s23, %s4247_s0 }
  0x69   : > { %p3251_p12 = pnand %p3250_p9, %p3249_p7  ;;  %p3255_p2 = scmp.lt.u32.totalorder %s3253_s22, %s3248_s24 }
  0x6a   : > { %p3257_p8 = scmp.lt.u32.totalorder %s3248_s24, %s3567_s23 }
  0x6b   : > { %p3252_p0 = pneg %p3251_p12  ;;  %p3256_p4 = por %p3255_p2, %p3254_p1 }
  0x6d   : > { %p3258_p13 = por %p3257_p8, %p3256_p4 }
  0x6f   : > { %p3259_p6 = pnand %p3258_p13, %p3252_p0 }
  0x71   : > { %3262 = shalt.err (!%p3259_p6)
}
  0x72   : > { %s3263_s20 = scalar_lea.vmem %s3573_s18, 2048  ;;  %s3361_s15 = smov [#allocation2]  }
  0x73   : > { %p3264_p10 = scmp.ne.s32.totalorder %s3573_s18, %s3263_s20  ;;  %s3268_s16 = sshll.u32 %s3361_s15, 4  ;;  %s3269_s16 = int_to_ptr.vmem [resolvable:$false] %s3268_s16 }
  0x74   : > { %s3270_s21 = scalar_lea.vmem %s3269_s16, 4096  ;;  %p3271_p12 = scmp.lt.s32.totalorder %s3573_s18, %s3269_s16 }
  0x75   : > { %p3266_p3 = pnand %p3264_p10, %p3250_p9  ;;  %p3272_p1 = scmp.lt.s32.totalorder %s3270_s21, %s3263_s20 }
  0x77   : > { %p3267_p7 = pneg %p3266_p3  ;;  %p3273_p2 = por %p3272_p1, %p3271_p12 }
  0x79   : > { %p3274_p4 = pnand %p3273_p2, %p3267_p7 }
  0x7b   : > { %3277 = shalt.err (!%p3274_p4)
}
  0x7c   : > { %3042 = dma.hbm_to_vmem [thread:$0]  (!%p3569_p11), %s3567_s23, 2048, %s3573_s18, %s3575_s27, %s4275_s17, %s4275_s17, %s4274_s14  }
  0x7d   : > { %p4279_p9 = scmp.ne.s32.totalorder %s4270_s13, 0 }
  0x7e   : > { %s3609_s24 = sand.u32 (!%p4279_p9), 1, %s3344_s28   ;;  %p4280_p0 = scmp.ne.s32.totalorder (!%p4279_p9), %s4267_s11, 0 }
  0x7f   : > { %317 = sbr.rel (%p4279_p9) target bundleno = 1714 (0x6b2), region = 52  ;;  %s2361_s22 = sshll.u32 (!%p4279_p9), %s3609_s24, 7 }
  0x80   : > { %s320_s26 = scalar_lea.sflag (!%p4279_p9), [#allocation3], %s3609_s24  ;;  %s3615_s1 = scalar_lea.vmem (!%p4279_p9), [#allocation2], %s2361_s22 }
  0x86   : > { %3323 = dma.done.wait (%p4280_p0), %s320_s26, 2048  }
  0x87   : > { %3325 = vsyncadd (%p4280_p0), %s320_s26, 4294965248  ;;  %p4281_p11 = scmp.eq.s32.totalorder %s3431_s9, 0 }
  0x89   : > { %3327 = dma.done.wait (%p4281_p11), [#allocation6], 32768   ;;  %p4282_p8 = pmov %p4281_p11 }
  0x8b   : > { %3329 = vsyncadd (%p4282_p8), [#allocation6], 4294934528  ;;  %p4283_p13 = pmov %p4282_p8 }
  0x8c   : > { %p4284_p6 = pmov %p4282_p8 }
  0x8d   : > { %3331 = dma.done.wait (%p4283_p13), [#allocation9], 8192  }
  0x8e   : > { %3333 = vsyncadd (%p4284_p6), [#allocation9], 4294959104  ;;  %v453_v0 = vld [vmem:[#allocation5 + $0x8] sm:$0xff]  ;;  %v455_v1 = vld [vmem:[#allocation5 + $0x18] sm:$0xff]  ;;  %vm1458_vm0 = vcmask 523264   ;;  %s4157_s20 = scalar_lea.vmem [#allocation10], %s2361_s22 }
  0x8f   : > { %v452_v2 = vld [vmem:[#allocation5] sm:$0xff]  ;;  %v2565_v3 = vpack.c.bf16 %v455_v1, %v453_v0  ;;  %v454_v4 = vld [vmem:[#allocation5 + $0x10] sm:$0xff]  ;;  %v457_v5 = vld [vmem:[#allocation5 + $0x28] sm:$0xff]  ;;  %s2388_s15 = sshll.u32 %s3431_s9, 11  ;;  %s2249_s16 = sshll.u32 %s4157_s20, 4  ;;  %s4200_s16 = int_to_ptr.vmem [resolvable:$true] %s2249_s16 }
  0x90   : > { %v459_v6 = vld [vmem:[#allocation5 + $0x38] sm:$0xff]  ;;  %v2567_v7 = vpack.c.bf16 %v454_v4, %v452_v2  ;;  %v456_v9 = vld [vmem:[#allocation5 + $0x20] sm:$0xff]  ;;  %v458_v10 = vld [vmem:[#allocation5 + $0x30] sm:$0xff]  ;;  %s4198_s26 = scalar_lea.hbm %s4255_s8, %s2388_s15  ;;  %s2236_s9 = scalar_lea.sflag [#allocation4], %s3609_s24 }
  0x91   : > { %v2569_v8 = vpack.c.bf16 %v459_v6, %v457_v5  ;;  %v461_v11 = vld [vmem:[#allocation5 + $0x48] sm:$0xff]  ;;  %2566 = vmatprep.subr.bf16.mxu0 %v2565_v3  ;;  %2630 = vmatprep.subr.bf16.mxu1 %v2565_v3  ;;  %v463_v12 = vld [vmem:[#allocation5 + $0x58] sm:$0xff]  ;;  %v2571_v13 = vpack.c.bf16 %v458_v10, %v456_v9  ;;  %v460_v15 = vld [vmem:[#allocation5 + $0x40] sm:$0xff]  ;;  %s3362_s11 = smov [#allocation10]  }
  0x92   : > { %2568 = vmatpush1.bf16.msra.mxu0 %v2567_v7  ;;  %2632 = vmatpush1.bf16.msra.mxu1 %v2567_v7  ;;  %v2573_v14 = vpack.c.bf16 %v463_v12, %v461_v11  ;;  %v462_v16 = vld [vmem:[#allocation5 + $0x50] sm:$0xff]  ;;  %v465_v17 = vld [vmem:[#allocation5 + $0x68] sm:$0xff]  ;;  %v467_v18 = vld [vmem:[#allocation5 + $0x78] sm:$0xff]  ;;  %s3282_s13 = sshll.u32 %s3362_s11, 4  ;;  %s3283_s13 = int_to_ptr.vmem [resolvable:$false] %s3282_s13 }
  0x93   : > { %2570 = vmatprep.subr.bf16.mxu0 %v2569_v8  ;;  %2634 = vmatprep.subr.bf16.mxu1 %v2569_v8  ;;  %v2575_v19 = vpack.c.bf16 %v462_v16, %v460_v15  ;;  %v2577_v20 = vpack.c.bf16 %v467_v18, %v465_v17  ;;  %v464_v21 = vld [vmem:[#allocation5 + $0x60] sm:$0xff]  ;;  %v466_v22 = vld [vmem:[#allocation5 + $0x70] sm:$0xff]  ;;  %v469_v23 = vld [vmem:[#allocation5 + $0x88] sm:$0xff]  ;;  %s3284_s14 = scalar_lea.vmem %s3283_s13, 4096  ;;  %p3285_p12 = scmp.lt.s32.totalorder %s4200_s16, %s3283_s13 }
  0x94   : > { %v471_v24 = vld [vmem:[#allocation5 + $0x98] sm:$0xff]  ;;  %v2579_v25 = vpack.c.bf16 %v466_v22, %v464_v21  ;;  %v468_v27 = vld [vmem:[#allocation5 + $0x80] sm:$0xff]  ;;  %v470_v28 = vld [vmem:[#allocation5 + $0x90] sm:$0xff] }
  0x95   : > { %v2581_v26 = vpack.c.bf16 %v471_v24, %v469_v23  ;;  %v473_v29 = vld [vmem:[#allocation5 + $0xa8] sm:$0xff]  ;;  %v475_v30 = vld [vmem:[#allocation5 + $0xb8] sm:$0xff]  ;;  %v2583_v31 = vpack.c.bf16 %v470_v28, %v468_v27  ;;  %v472_v33 = vld [vmem:[#allocation5 + $0xa0] sm:$0xff] }
  0x96   : > { %2572 = vmatpush1.bf16.msra.mxu0 %v2571_v13  ;;  %2636 = vmatpush1.bf16.msra.mxu1 %v2571_v13  ;;  %v2585_v32 = vpack.c.bf16 %v475_v30, %v473_v29  ;;  %v474_v34 = vld [vmem:[#allocation5 + $0xb0] sm:$0xff]  ;;  %v477_v35 = vld [vmem:[#allocation5 + $0xc8] sm:$0xff]  ;;  %v479_v36 = vld [vmem:[#allocation5 + $0xd8] sm:$0xff] }
  0x97   : > { %2574 = vmatprep.subr.bf16.mxu0 %v2573_v14  ;;  %2638 = vmatprep.subr.bf16.mxu1 %v2573_v14  ;;  %v2587_v37 = vpack.c.bf16 %v474_v34, %v472_v33  ;;  %v476_v38 = vld [vmem:[#allocation5 + $0xc0] sm:$0xff]  ;;  %v478_v39 = vld [vmem:[#allocation5 + $0xd0] sm:$0xff]  ;;  %v481_v40 = vld [vmem:[#allocation5 + $0xe8] sm:$0xff]  ;;  %v2589_v41 = vpack.c.bf16 %v479_v36, %v477_v35 }
  0x98   : > { %v483_v42 = vld [vmem:[#allocation5 + $0xf8] sm:$0xff]  ;;  %v3630_v43 = vld [vmem:[%s3615_s1 + $0x8] sm:$0xff]  ;;  %v480_v50 = vld [vmem:[#allocation5 + $0xe0] sm:$0xff]  ;;  %v2591_v54 = vpack.c.bf16 %v478_v39, %v476_v38 }
  0x99   : > { %v3633_v44 = vld [vmem:[%s3615_s1 + $0x18] sm:$0xff]  ;;  %v3636_v45 = vld [vmem:[%s3615_s1 + $0x28] sm:$0xff]  ;;  %v411_v48 = vmul.f32 %v3630_v43, %v3630_v43  ;;  %v482_v51 = vld [vmem:[#allocation5 + $0xf0] sm:$0xff]  ;;  %v2593_v55 = vpack.c.bf16 %v483_v42, %v481_v40 }
  0x9a   : > { %2576 = vmatpush1.bf16.msra.mxu0 %v2575_v19  ;;  %2640 = vmatpush1.bf16.msra.mxu1 %v2575_v19  ;;  %v3639_v46 = vld [vmem:[%s3615_s1 + $0x38] sm:$0xff]  ;;  %v397_v47 = vadd.f32 %v3633_v44, %v3630_v43  ;;  %v413_v49 = vmul.f32 %v3633_v44, %v3633_v44  ;;  %v3648_v52 = vld [vmem:[%s3615_s1 + $0x48] sm:$0xff]  ;;  %v415_v53 = vmul.f32 %v3636_v45, %v3636_v45  ;;  %v3654_v57 = vld [vmem:[%s3615_s1] sm:$0xff] }
  0x9b   : > { %2578 = vmatprep.subr.bf16.mxu0 %v2577_v20  ;;  %2642 = vmatprep.subr.bf16.mxu1 %v2577_v20  ;;  %v3657_v58 = vld [vmem:[%s3615_s1 + $0x10] sm:$0xff]  ;;  %v3660_v59 = vld [vmem:[%s3615_s1 + $0x20] sm:$0xff]  ;;  %v485_v60 = vld [vmem:[#allocation5 + $0x108] sm:$0xff]  ;;  %v417_v63 = vmul.f32 %v3639_v46, %v3639_v46  ;;  %v410_v4 = vmul.f32 %v3654_v57, %v3654_v57  ;;  %v2595_v6 = vpack.c.bf16 %v482_v51, %v480_v50 }
  0x9c   : > { %v398_v56 = vadd.f32 %v397_v47, %v3636_v45  ;;  %v487_v61 = vld [vmem:[#allocation5 + $0x118] sm:$0xff]  ;;  %v384_v62 = vadd.f32 %v3657_v58, %v3654_v57  ;;  %v439_v0 = vadd.f32 %v413_v49, %v411_v48  ;;  %v3671_v3 = vld [vmem:[%s3615_s1 + $0x30] sm:$0xff]  ;;  %v412_v5 = vmul.f32 %v3657_v58, %v3657_v58  ;;  %v484_v7 = vld [vmem:[#allocation5 + $0x100] sm:$0xff] }
  0x9d   : > { %v3667_v1 = vld [vmem:[%s3615_s1 + $0x58] sm:$0xff]  ;;  %v486_v8 = vld [vmem:[#allocation5 + $0x110] sm:$0xff]  ;;  %v489_v9 = vld [vmem:[#allocation5 + $0x128] sm:$0xff]  ;;  %v419_v11 = vmul.f32 %v3648_v52, %v3648_v52  ;;  %v2597_v13 = vpack.c.bf16 %v487_v61, %v485_v60  ;;  %v414_v18 = vmul.f32 %v3660_v59, %v3660_v59 }
  0x9e   : > { %2580 = vmatpush1.bf16.msra.mxu0 %v2579_v25  ;;  %2644 = vmatpush1.bf16.msra.mxu1 %v2579_v25  ;;  %v399_v2 = vadd.f32 %v398_v56, %v3639_v46  ;;  %v385_v10 = vadd.f32 %v384_v62, %v3660_v59  ;;  %v440_v12 = vadd.f32 %v439_v0, %v415_v53  ;;  %v491_v14 = vld [vmem:[#allocation5 + $0x138] sm:$0xff]  ;;  %v3681_v15 = vld [vmem:[%s3615_s1 + $0x68] sm:$0xff]  ;;  %v3685_v17 = vld [vmem:[%s3615_s1 + $0x40] sm:$0xff] }
  0x9f   : > { %2582 = vmatprep.subr.bf16.mxu0 %v2581_v26  ;;  %2646 = vmatprep.subr.bf16.mxu1 %v2581_v26  ;;  %v421_v20 = vmul.f32 %v3667_v1, %v3667_v1  ;;  %v2599_v22 = vpack.c.bf16 %v486_v8, %v484_v7  ;;  %v3693_v23 = vld [vmem:[%s3615_s1 + $0x78] sm:$0xff]  ;;  %v3697_v25 = vld [vmem:[%s3615_s1 + $0x50] sm:$0xff]  ;;  %v416_v26 = vmul.f32 %v3671_v3, %v3671_v3  ;;  %v3706_v33 = vld [vmem:[%s3615_s1 + $0x60] sm:$0xff] }
  0xa0   : > { %v400_v16 = vadd.f32 %v399_v2, %v3648_v52  ;;  %v386_v19 = vadd.f32 %v385_v10, %v3671_v3  ;;  %v441_v21 = vadd.f32 %v440_v12, %v417_v63  ;;  %v426_v27 = vadd.f32 %v412_v5, %v410_v4  ;;  %v488_v36 = vld [vmem:[#allocation5 + $0x120] sm:$0xff]  ;;  %v495_v42 = vld [vmem:[#allocation5 + $0x158] sm:$0xff]  ;;  %v3717_v50 = vld [vmem:[%s3615_s1 + $0x70] sm:$0xff]  ;;  %s3278_s1 = scalar_lea.vmem %s4200_s16, 2048 }
  0xa1   : > { %v2601_v28 = vpack.c.bf16 %v491_v14, %v489_v9  ;;  %v423_v30 = vmul.f32 %v3681_v15, %v3681_v15  ;;  %v418_v34 = vmul.f32 %v3685_v17, %v3685_v17  ;;  %v425_v39 = vmul.f32 %v3693_v23, %v3693_v23  ;;  %v492_v62 = vld [vmem:[#allocation5 + $0x140] sm:$0xff]  ;;  %v494_v63 = vld [vmem:[#allocation5 + $0x150] sm:$0xff]  ;;  %v497_v2 = vld [vmem:[#allocation5 + $0x168] sm:$0xff]  ;;  %p3279_p10 = scmp.ne.s32.totalorder %s4200_s16, %s3278_s1  ;;  %p3286_p1 = scmp.lt.s32.totalorder %s3284_s14, %s3278_s1 }
  0xa2   : > { %2584 = vmatpush1.bf16.msra.mxu0 %v2583_v31  ;;  %2648 = vmatpush1.bf16.msra.mxu1 %v2583_v31  ;;  %v401_v24 = vadd.f32 %v400_v16, %v3667_v1  ;;  %v387_v29 = vadd.f32 %v386_v19, %v3685_v17  ;;  %v442_v31 = vadd.f32 %v441_v21, %v419_v11  ;;  %v499_v4 = vld [vmem:[#allocation5 + $0x178] sm:$0xff]  ;;  %v496_v14 = vld [vmem:[#allocation5 + $0x160] sm:$0xff]  ;;  %v498_v16 = vld [vmem:[#allocation5 + $0x170] sm:$0xff] }
  0xa3   : > { %2586 = vmatprep.subr.bf16.mxu0 %v2585_v32  ;;  %2650 = vmatprep.subr.bf16.mxu1 %v2585_v32  ;;  %v427_v35 = vadd.f32 %v426_v27, %v414_v18  ;;  %v420_v48 = vmul.f32 %v3697_v25, %v3697_v25  ;;  %v422_v56 = vmul.f32 %v3706_v33, %v3706_v33  ;;  %v501_v19 = vld [vmem:[#allocation5 + $0x188] sm:$0xff]  ;;  %p3280_p3 = pnand %p3279_p10, %p3558_p5  ;;  %p3287_p2 = por %p3286_p1, %p3285_p12 }
  0xa4   : > { %v402_v32 = vadd.f32 %v401_v24, %v3681_v15  ;;  %v388_v38 = vadd.f32 %v387_v29, %v3697_v25  ;;  %v443_v40 = vadd.f32 %v442_v31, %v421_v20  ;;  %v2607_v10 = vpack.c.bf16 %v494_v63, %v492_v62  ;;  %v503_v20 = vld [vmem:[#allocation5 + $0x198] sm:$0xff]  ;;  %v500_v31 = vld [vmem:[#allocation5 + $0x180] sm:$0xff]  ;;  %v510_v62 = vld [vmem:[#allocation5 + $0x1d0] sm:$0xff] }
  0xa5   : > { %v428_v49 = vadd.f32 %v427_v35, %v416_v26  ;;  %v2611_v27 = vpack.c.bf16 %v498_v16, %v496_v14  ;;  %v505_v35 = vld [vmem:[#allocation5 + $0x1a8] sm:$0xff]  ;;  %p3281_p7 = pneg %p3280_p3 }
  0xa6   : > { %2588 = vmatpush1.bf16.msra.mxu0 %v2587_v37  ;;  %2652 = vmatpush1.bf16.msra.mxu1 %v2587_v37  ;;  %v490_v37 = vld [vmem:[#allocation5 + $0x130] sm:$0xff]  ;;  %v403_v47 = vadd.f32 %v402_v32, %v3693_v23  ;;  %v389_v51 = vadd.f32 %v388_v38, %v3706_v33  ;;  %v444_v53 = vadd.f32 %v443_v40, %v423_v30  ;;  %v513_v63 = vld [vmem:[#allocation5 + $0x1e8] sm:$0xff] }
  0xa7   : > { %2590 = vmatprep.subr.bf16.mxu0 %v2589_v41  ;;  %2654 = vmatprep.subr.bf16.mxu1 %v2589_v41  ;;  %v493_v41 = vld [vmem:[#allocation5 + $0x148] sm:$0xff]  ;;  %v429_v60 = vadd.f32 %v428_v49, %v418_v34  ;;  %v2613_v30 = vpack.c.bf16 %v503_v20, %v501_v19  ;;  %v502_v32 = vld [vmem:[#allocation5 + $0x190] sm:$0xff]  ;;  %p3288_p4 = pnand %p3287_p2, %p3281_p7 }
  0xa8   : > { %v2605_v61 = vpack.c.bf16 %v495_v42, %v493_v41  ;;  %v445_v0 = vadd.f32 %v444_v53, %v425_v39  ;;  %v390_v8 = vadd.f32 %v389_v51, %v3717_v50  ;;  %v2615_v41 = vpack.c.bf16 %v502_v32, %v500_v31  ;;  %v509_v51 = vld [vmem:[#allocation5 + $0x1c8] sm:$0xff]  ;;  %v511_v53 = vld [vmem:[#allocation5 + $0x1d8] sm:$0xff]  ;;  %v780_v19 = vld [vmem:[#allocation7 + $0x30] sm:$0xff] }
  0xa9   : > { %v430_v7 = vadd.f32 %v429_v60, %v420_v48  ;;  %v506_v48 = vld [vmem:[#allocation5 + $0x1b0] sm:$0xff]  ;;  %v2621_v60 = vpack.c.bf16 %v511_v53, %v509_v51  ;;  %v798_v53 = vld [vmem:[#allocation7 + $0xc0] sm:$0xff] }
  0xaa   : > { %2592 = vmatpush1.bf16.msra.mxu0 %v2591_v54  ;;  %2656 = vmatpush1.bf16.msra.mxu1 %v2591_v54  ;;  %v2603_v54 = vpack.c.bf16 %v490_v37, %v488_v36  ;;  %v446_v9 = vrot.slane %v445_v0, 4  ;;  %v391_v24 = vrot.slane %v390_v8, 4  ;;  %v507_v36 = vld [vmem:[#allocation5 + $0x1b8] sm:$0xff] }
  0xab   : > { %2594 = vmatprep.subr.bf16.mxu0 %v2593_v55  ;;  %2658 = vmatprep.subr.bf16.mxu1 %v2593_v55  ;;  %v404_v55 = vrot.slane %v403_v47, 4  ;;  %v431_v12 = vadd.f32 %v430_v7, %v422_v56  ;;  %v2617_v42 = vpack.c.bf16 %v507_v36, %v505_v35  ;;  %v512_v7 = vld [vmem:[#allocation5 + $0x1e0] sm:$0xff]  ;;  %v792_v36 = vld [vmem:[#allocation7 + $0x90] sm:$0xff] }
  0xac   : > { %v447_v18 = vadd.f32 %v446_v9, %v445_v0  ;;  %v392_v38 = vadd.f32 %v391_v24, %v390_v8  ;;  %v515_v0 = vld [vmem:[#allocation5 + $0x1f8] sm:$0xff]  ;;  %v514_v8 = vld [vmem:[#allocation5 + $0x1f0] sm:$0xff]  ;;  %v775_v9 = vld [vmem:[#allocation7 + $0x8] sm:$0xff] }
  0xad   : > { %v405_v5 = vadd.f32 %v404_v55, %v403_v47  ;;  %v504_v47 = vld [vmem:[#allocation5 + $0x1a0] sm:$0xff]  ;;  %v2627_v16 = vpack.c.bf16 %v514_v8, %v512_v7  ;;  %v816_v7 = vld [vmem:[#allocation7 + $0x150] sm:$0xff] }
  0xae   : > { %2596 = vmatpush1.bf16.msra.mxu0 %v2595_v6  ;;  %2660 = vmatpush1.bf16.msra.mxu1 %v2595_v6  ;;  %v424_v6 = vmul.f32 %v3717_v50, %v3717_v50  ;;  %v448_v26 = vrot.slane %v447_v18, 2  ;;  %v2619_v56 = vpack.c.bf16 %v506_v48, %v504_v47  ;;  %v782_v24 = vld [vmem:[#allocation7 + $0x40] sm:$0xff]  ;;  %v801_v47 = vld [vmem:[#allocation7 + $0xd8] sm:$0xff]  ;;  %v807_v48 = vld [vmem:[#allocation7 + $0x108] sm:$0xff] }
  0xaf   : > { %2598 = vmatprep.subr.bf16.mxu0 %v2597_v13  ;;  %2662 = vmatprep.subr.bf16.mxu1 %v2597_v13  ;;  %v406_v11 = vrot.slane %v405_v5, 2  ;;  %v2609_v13 = vpack.c.bf16 %v499_v4, %v497_v2  ;;  %v786_v35 = vld [vmem:[#allocation7 + $0x60] sm:$0xff] }
  0xb0   : > { %v449_v34 = vadd.f32 %v448_v26, %v447_v18  ;;  %v774_v18 = vld [vmem:[#allocation7] sm:$0xff]  ;;  %v787_v26 = vld [vmem:[#allocation7 + $0x68] sm:$0xff] }
  0xb1   : > { %v407_v21 = vadd.f32 %v406_v11, %v405_v5  ;;  %v777_v11 = vld [vmem:[#allocation7 + $0x18] sm:$0xff]  ;;  %v2695_v32 = vpack.c.bf16 %v780_v19, %v774_v18 }
  0xb2   : > { %2600 = vmatpush1.bf16.msra.mxu0 %v2599_v22  ;;  %2664 = vmatpush1.bf16.msra.mxu1 %v2599_v22  ;;  %v432_v22 = vadd.f32 %v431_v12, %v424_v6  ;;  %v450_v39 = vrot.slane %v449_v34, 1  ;;  %v2625_v6 = vpack.c.bf16 %v515_v0, %v513_v63  ;;  %v783_v12 = vld [vmem:[#allocation7 + $0x48] sm:$0xff]  ;;  %v817_v63 = vld [vmem:[#allocation7 + $0x158] sm:$0xff] }
  0xb3   : > { %2602 = vmatprep.subr.bf16.mxu0 %v2601_v28  ;;  %2666 = vmatprep.subr.bf16.mxu1 %v2601_v28  ;;  %v408_v28 = vrot.slane %v407_v21, 1  ;;  %v813_v0 = vld [vmem:[#allocation7 + $0x138] sm:$0xff] }
  0xb4   : > { %v433_v29 = vrot.slane %v432_v22, 4  ;;  %v451_v49 = vadd.f32 %v450_v39, %v449_v34  ;;  %v788_v39 = vld [vmem:[#allocation7 + $0x70] sm:$0xff] }
  0xb5   : > { %v409_v37 = vadd.f32 %v408_v28, %v407_v21  ;;  %v2757_v21 = vpack.c.bf16 %v783_v12, %v777_v11  ;;  %v789_v28 = vld [vmem:[#allocation7 + $0x78] sm:$0xff]  ;;  %v818_v11 = vld [vmem:[#allocation7 + $0x160] sm:$0xff]  ;;  %v823_v12 = vld [vmem:[#allocation7 + $0x188] sm:$0xff] }
  0xb6   : > { %2604 = vmatpush1.bf16.msra.mxu0 %v2603_v54  ;;  %2668 = vmatpush1.bf16.msra.mxu1 %v2603_v54  ;;  %v434_v40 = vadd.f32 %v433_v29, %v432_v22  ;;  %v393_v54 = vrot.slane %v392_v38, 2  ;;  %v776_v22 = vld [vmem:[#allocation7 + $0x10] sm:$0xff]  ;;  %v795_v29 = vld [vmem:[#allocation7 + $0xa8] sm:$0xff] }
  0xb7   : > { %2606 = vmatprep.subr.bf16.mxu0 %v2605_v61  ;;  %2670 = vmatprep.subr.bf16.mxu1 %v2605_v61  ;;  %v508_v61 = vld [vmem:[#allocation5 + $0x1c0] sm:$0xff]  ;;  %v2759_v34 = vpack.c.bf16 %v782_v24, %v776_v22 }
  0xb8   : > { %580 = vmatprep.mubr.f32.mxu0 %v409_v37  ;;  %653 = vmatprep.mubr.f32.mxu1 %v451_v49  ;;  %v435_v55 = vrot.slane %v434_v40, 2  ;;  %v394_v2 = vadd.f32 %v393_v54, %v392_v38  ;;  %v2623_v5 = vpack.c.bf16 %v510_v62, %v508_v61  ;;  %v2761_v38 = vpack.c.bf16 %v795_v29, %v789_v28  ;;  %v804_v54 = vld [vmem:[#allocation7 + $0xf0] sm:$0xff]  ;;  %v806_v61 = vld [vmem:[#allocation7 + $0x100] sm:$0xff]  ;;  %v811_v62 = vld [vmem:[#allocation7 + $0x128] sm:$0xff] }
  0xb9   : > { %v2699_v49 = vpack.c.bf16 %v792_v36, %v786_v35  ;;  %v2705_v8 = vpack.c.bf16 %v817_v63, %v811_v62  ;;  %v835_v28 = vld [vmem:[#allocation7 + $0x1e8] sm:$0xff]  ;;  %v841_v29 = vld [vmem:[#allocation7 + $0x218] sm:$0xff]  ;;  %v834_v35 = vld [vmem:[#allocation7 + $0x1e0] sm:$0xff] }
  0xba   : > { %2608 = vmatpush1.bf16.msra.mxu0 %v2607_v10  ;;  %2672 = vmatpush1.bf16.msra.mxu1 %v2607_v10  ;;  %v436_v4 = vadd.f32 %v435_v55, %v434_v40  ;;  %v781_v10 = vld [vmem:[#allocation7 + $0x38] sm:$0xff]  ;;  %v794_v40 = vld [vmem:[#allocation7 + $0xa0] sm:$0xff]  ;;  %v840_v36 = vld [vmem:[#allocation7 + $0x210] sm:$0xff] }
  0xbb   : > { %2610 = vmatprep.subr.bf16.mxu0 %v2609_v13  ;;  %2674 = vmatprep.subr.bf16.mxu1 %v2609_v13  ;;  %v395_v13 = vrot.slane %v394_v2, 1  ;;  %v2693_v20 = vpack.c.bf16 %v781_v10, %v775_v9  ;;  %v2763_v51 = vpack.c.bf16 %v794_v40, %v788_v39  ;;  %v812_v10 = vld [vmem:[#allocation7 + $0x130] sm:$0xff]  ;;  %v842_v40 = vld [vmem:[#allocation7 + $0x220] sm:$0xff]  ;;  %v859_v62 = vld [vmem:[#allocation7 + $0x2a8] sm:$0xff] }
  0xbc   : > { %v437_v14 = vrot.slane %v436_v4, 1  ;;  %v2771_v19 = vpack.c.bf16 %v818_v11, %v812_v10  ;;  %v836_v39 = vld [vmem:[#allocation7 + $0x1f0] sm:$0xff]  ;;  %v865_v63 = vld [vmem:[#allocation7 + $0x2d8] sm:$0xff]  ;;  %v866_v11 = vld [vmem:[#allocation7 + $0x2e0] sm:$0xff] }
  0xbd   : > { %v860_v10 = vld [vmem:[#allocation7 + $0x2b0] sm:$0xff] }
  0xbe   : > { %2612 = vmatpush1.bf16.msra.mxu0 %v2611_v27  ;;  %2676 = vmatpush1.bf16.msra.mxu1 %v2611_v27  ;;  %v793_v27 = vld [vmem:[#allocation7 + $0x98] sm:$0xff]  ;;  %v438_v31 = vadd.f32 %v437_v14, %v436_v4  ;;  %v2703_v4 = vpack.c.bf16 %v804_v54, %v798_v53  ;;  %v846_v53 = vld [vmem:[#allocation7 + $0x240] sm:$0xff]  ;;  %v852_v54 = vld [vmem:[#allocation7 + $0x270] sm:$0xff] }
  0xbf   : > { %2614 = vmatprep.subr.bf16.mxu0 %v2613_v30  ;;  %2678 = vmatprep.subr.bf16.mxu1 %v2613_v30  ;;  %v396_v30 = vadd.f32 %v395_v13, %v394_v2  ;;  %v2697_v37 = vpack.c.bf16 %v793_v27, %v787_v26  ;;  %v819_v2 = vld [vmem:[#allocation7 + $0x168] sm:$0xff]  ;;  %v829_v13 = vld [vmem:[#allocation7 + $0x1b8] sm:$0xff]  ;;  %v824_v26 = vld [vmem:[#allocation7 + $0x190] sm:$0xff] }
  0xc0   : > { %v2769_v9 = vpack.c.bf16 %v819_v2, %v813_v0  ;;  %v825_v14 = vld [vmem:[#allocation7 + $0x198] sm:$0xff]  ;;  %v2709_v22 = vpack.c.bf16 %v829_v13, %v823_v12  ;;  %v830_v27 = vld [vmem:[#allocation7 + $0x1c0] sm:$0xff]  ;;  %v867_v2 = vld [vmem:[#allocation7 + $0x2e8] sm:$0xff] }
  0xc1   : > { %v861_v0 = vld [vmem:[#allocation7 + $0x2b8] sm:$0xff]  ;;  %v871_v12 = vld [vmem:[#allocation7 + $0x308] sm:$0xff] }
  0xc2   : > { %2616 = vmatpush1.bf16.msra.mxu0 %v2615_v41  ;;  %2680 = vmatpush1.bf16.msra.mxu1 %v2615_v41  ;;  %v799_v41 = vld [vmem:[#allocation7 + $0xc8] sm:$0xff]  ;;  %v877_v13 = vld [vmem:[#allocation7 + $0x338] sm:$0xff] }
  0xc3   : > { %2618 = vmatprep.subr.bf16.mxu0 %v2617_v42  ;;  %2682 = vmatprep.subr.bf16.mxu1 %v2617_v42  ;;  %v805_v42 = vld [vmem:[#allocation7 + $0xf8] sm:$0xff] }
  0xc4   : > { %v2701_v55 = vpack.c.bf16 %v805_v42, %v799_v41  ;;  %v847_v41 = vld [vmem:[#allocation7 + $0x248] sm:$0xff]  ;;  %v853_v42 = vld [vmem:[#allocation7 + $0x278] sm:$0xff] }
  0xc6   : > { %2620 = vmatpush1.bf16.msra.mxu0 %v2619_v56  ;;  %2684 = vmatpush1.bf16.msra.mxu1 %v2619_v56  ;;  %v2765_v56 = vpack.c.bf16 %v807_v48, %v801_v47  ;;  %v849_v47 = vld [vmem:[#allocation7 + $0x258] sm:$0xff]  ;;  %v855_v48 = vld [vmem:[#allocation7 + $0x288] sm:$0xff] }
  0xc7   : > { %2622 = vmatprep.subr.bf16.mxu0 %v2621_v60  ;;  %2686 = vmatprep.subr.bf16.mxu1 %v2621_v60  ;;  %v800_v60 = vld [vmem:[#allocation7 + $0xd0] sm:$0xff] }
  0xca   : > { %2624 = vmatpush1.bf16.msra.mxu0 %v2623_v5  ;;  %2688 = vmatpush1.bf16.msra.mxu1 %v2623_v5  ;;  %v2767_v5 = vpack.c.bf16 %v806_v61, %v800_v60  ;;  %v848_v60 = vld [vmem:[#allocation7 + $0x250] sm:$0xff]  ;;  %v854_v61 = vld [vmem:[#allocation7 + $0x280] sm:$0xff] }
  0xcb   : > { %2626 = vmatprep.subr.bf16.mxu0 %v2625_v6  ;;  %2690 = vmatprep.subr.bf16.mxu1 %v2625_v6  ;;  %v810_v6 = vld [vmem:[#allocation7 + $0x120] sm:$0xff] }
  0xcc   : > { %v2707_v18 = vpack.c.bf16 %v816_v7, %v810_v6  ;;  %v858_v6 = vld [vmem:[#allocation7 + $0x2a0] sm:$0xff]  ;;  %v864_v7 = vld [vmem:[#allocation7 + $0x2d0] sm:$0xff] }
  0xce   : > { %2628 = vmatpush1.bf16.msra.mxu0 %v2627_v16  ;;  %2692 = vmatpush1.bf16.msra.mxu1 %v2627_v16  ;;  %v831_v16 = vld [vmem:[#allocation7 + $0x1c8] sm:$0xff] }
  0xcf   : > { %2694 = vmatprep.subr.bf16.mxu0 %v2693_v20  ;;  %2758 = vmatprep.subr.bf16.mxu1 %v2757_v21  ;;  %v822_v20 = vld [vmem:[#allocation7 + $0x180] sm:$0xff]  ;;  %v828_v21 = vld [vmem:[#allocation7 + $0x1b0] sm:$0xff]  ;;  %v2773_v24 = vpack.c.bf16 %v831_v16, %v825_v14  ;;  %v873_v14 = vld [vmem:[#allocation7 + $0x318] sm:$0xff] }
  0xd0   : > { %v879_v16 = vld [vmem:[#allocation7 + $0x348] sm:$0xff] }
  0xd1   : > { %581 = vmatmul.mubr.f32.vlgmr.msra.gmra.mrb[0].mxu0 %v396_v30  ;;  %654 = vmatmul.mubr.f32.vlgmr.msra.gmra.mrb[0].mxu1 %v438_v31  ;;  %v837_v30 = vld [vmem:[#allocation7 + $0x1f8] sm:$0xff]  ;;  %v843_v31 = vld [vmem:[#allocation7 + $0x228] sm:$0xff] }
  0xd2   : > { %2696 = vmatpush1.bf16.msra.mxu0 %v2695_v32  ;;  %2760 = vmatpush1.bf16.msra.mxu1 %v2759_v34  ;;  %v2711_v32 = vpack.c.bf16 %v828_v21, %v822_v20  ;;  %v2775_v34 = vpack.c.bf16 %v830_v27, %v824_v26  ;;  %v870_v20 = vld [vmem:[#allocation7 + $0x300] sm:$0xff]  ;;  %v2725_v21 = vpack.c.bf16 %v877_v13, %v871_v12  ;;  %v872_v26 = vld [vmem:[#allocation7 + $0x310] sm:$0xff] }
  0xd3   : > { %2698 = vmatprep.subr.bf16.mxu0 %v2697_v37  ;;  %2762 = vmatprep.subr.bf16.mxu1 %v2761_v38  ;;  %v2713_v37 = vpack.c.bf16 %v841_v29, %v835_v28  ;;  %v2777_v38 = vpack.c.bf16 %v843_v31, %v837_v30  ;;  %v878_v27 = vld [vmem:[#allocation7 + $0x340] sm:$0xff]  ;;  %v883_v30 = vld [vmem:[#allocation7 + $0x368] sm:$0xff]  ;;  %v889_v31 = vld [vmem:[#allocation7 + $0x398] sm:$0xff] }
  0xd4   : > { %v2791_v29 = vpack.c.bf16 %v878_v27, %v872_v26  ;;  %v920_v26 = vld [vmem:[#allocation7 + $0x490] sm:$0xff]  ;;  %v926_v27 = vld [vmem:[#allocation7 + $0x4c0] sm:$0xff] }
  0xd6   : > { %2700 = vmatpush1.bf16.msra.mxu0 %v2699_v49  ;;  %2764 = vmatpush1.bf16.msra.mxu1 %v2763_v51  ;;  %v2715_v49 = vpack.c.bf16 %v840_v36, %v834_v35  ;;  %v2779_v51 = vpack.c.bf16 %v842_v40, %v836_v39  ;;  %v888_v35 = vld [vmem:[#allocation7 + $0x390] sm:$0xff]  ;;  %v885_v36 = vld [vmem:[#allocation7 + $0x378] sm:$0xff]  ;;  %v890_v40 = vld [vmem:[#allocation7 + $0x3a0] sm:$0xff] }
  0xd7   : > { %2702 = vmatprep.subr.bf16.mxu0 %v2701_v55  ;;  %2766 = vmatprep.subr.bf16.mxu1 %v2765_v56  ;;  %v2717_v55 = vpack.c.bf16 %v853_v42, %v847_v41  ;;  %v2781_v56 = vpack.c.bf16 %v855_v48, %v849_v47  ;;  %v884_v39 = vld [vmem:[#allocation7 + $0x370] sm:$0xff]  ;;  %v895_v47 = vld [vmem:[#allocation7 + $0x3c8] sm:$0xff]  ;;  %v901_v48 = vld [vmem:[#allocation7 + $0x3f8] sm:$0xff] }
  0xd8   : > { %v2795_v42 = vpack.c.bf16 %v890_v40, %v884_v39  ;;  %v932_v39 = vld [vmem:[#allocation7 + $0x4f0] sm:$0xff]  ;;  %v938_v40 = vld [vmem:[#allocation7 + $0x520] sm:$0xff] }
  0xda   : > { %2704 = vmatpush1.bf16.msra.mxu0 %v2703_v4  ;;  %2768 = vmatpush1.bf16.msra.mxu1 %v2767_v5  ;;  %v2719_v4 = vpack.c.bf16 %v852_v54, %v846_v53  ;;  %v2783_v5 = vpack.c.bf16 %v854_v61, %v848_v60  ;;  %v900_v53 = vld [vmem:[#allocation7 + $0x3f0] sm:$0xff]  ;;  %v897_v54 = vld [vmem:[#allocation7 + $0x3d8] sm:$0xff]  ;;  %v902_v61 = vld [vmem:[#allocation7 + $0x400] sm:$0xff] }
  0xdb   : > { %2706 = vmatprep.subr.bf16.mxu0 %v2705_v8  ;;  %2770 = vmatprep.subr.bf16.mxu1 %v2769_v9  ;;  %v2721_v8 = vpack.c.bf16 %v865_v63, %v859_v62  ;;  %v2785_v9 = vpack.c.bf16 %v867_v2, %v861_v0  ;;  %v896_v60 = vld [vmem:[#allocation7 + $0x3d0] sm:$0xff]  ;;  %v907_v0 = vld [vmem:[#allocation7 + $0x428] sm:$0xff]  ;;  %v913_v2 = vld [vmem:[#allocation7 + $0x458] sm:$0xff] }
  0xdc   : > { %v2799_v63 = vpack.c.bf16 %v902_v61, %v896_v60  ;;  %v944_v60 = vld [vmem:[#allocation7 + $0x550] sm:$0xff]  ;;  %v950_v61 = vld [vmem:[#allocation7 + $0x580] sm:$0xff] }
  0xde   : > { %2708 = vmatpush1.bf16.msra.mxu0 %v2707_v18  ;;  %2772 = vmatpush1.bf16.msra.mxu1 %v2771_v19  ;;  %v2723_v18 = vpack.c.bf16 %v864_v7, %v858_v6  ;;  %v2787_v19 = vpack.c.bf16 %v866_v11, %v860_v10  ;;  %v912_v6 = vld [vmem:[#allocation7 + $0x450] sm:$0xff]  ;;  %v909_v7 = vld [vmem:[#allocation7 + $0x438] sm:$0xff]  ;;  %v914_v11 = vld [vmem:[#allocation7 + $0x460] sm:$0xff] }
  0xdf   : > { %2710 = vmatprep.subr.bf16.mxu0 %v2709_v22  ;;  %2774 = vmatprep.subr.bf16.mxu1 %v2773_v24  ;;  %v876_v22 = vld [vmem:[#allocation7 + $0x330] sm:$0xff]  ;;  %v2789_v24 = vpack.c.bf16 %v879_v16, %v873_v14  ;;  %v919_v14 = vld [vmem:[#allocation7 + $0x488] sm:$0xff]  ;;  %v925_v16 = vld [vmem:[#allocation7 + $0x4b8] sm:$0xff] }
  0xe0   : > { %v2727_v28 = vpack.c.bf16 %v876_v22, %v870_v20  ;;  %v908_v10 = vld [vmem:[#allocation7 + $0x430] sm:$0xff] }
  0xe1   : > { %v2803_v13 = vpack.c.bf16 %v914_v11, %v908_v10  ;;  %v924_v20 = vld [vmem:[#allocation7 + $0x4b0] sm:$0xff] }
  0xe2   : > { %2712 = vmatpush1.bf16.msra.mxu0 %v2711_v32  ;;  %2776 = vmatpush1.bf16.msra.mxu1 %v2775_v34  ;;  %v2729_v32 = vpack.c.bf16 %v889_v31, %v883_v30  ;;  %v882_v34 = vld [vmem:[#allocation7 + $0x360] sm:$0xff]  ;;  %v931_v30 = vld [vmem:[#allocation7 + $0x4e8] sm:$0xff]  ;;  %v937_v31 = vld [vmem:[#allocation7 + $0x518] sm:$0xff] }
  0xe3   : > { %2714 = vmatprep.subr.bf16.mxu0 %v2713_v37  ;;  %2778 = vmatprep.subr.bf16.mxu1 %v2777_v38  ;;  %v2731_v37 = vpack.c.bf16 %v888_v35, %v882_v34  ;;  %v891_v38 = vld [vmem:[#allocation7 + $0x3a8] sm:$0xff]  ;;  %v930_v34 = vld [vmem:[#allocation7 + $0x4e0] sm:$0xff]  ;;  %v936_v35 = vld [vmem:[#allocation7 + $0x510] sm:$0xff] }
  0xe4   : > { %v2793_v41 = vpack.c.bf16 %v891_v38, %v885_v36  ;;  %v933_v36 = vld [vmem:[#allocation7 + $0x4f8] sm:$0xff]  ;;  %v939_v38 = vld [vmem:[#allocation7 + $0x528] sm:$0xff]  ;;  %v956_v11 = vld [vmem:[#allocation7 + $0x5b0] sm:$0xff] }
  0xe6   : > { %2716 = vmatpush1.bf16.msra.mxu0 %v2715_v49  ;;  %2780 = vmatpush1.bf16.msra.mxu1 %v2779_v51  ;;  %v2733_v49 = vpack.c.bf16 %v901_v48, %v895_v47  ;;  %v894_v51 = vld [vmem:[#allocation7 + $0x3c0] sm:$0xff]  ;;  %v943_v47 = vld [vmem:[#allocation7 + $0x548] sm:$0xff]  ;;  %v949_v48 = vld [vmem:[#allocation7 + $0x578] sm:$0xff] }
  0xe7   : > { %2718 = vmatprep.subr.bf16.mxu0 %v2717_v55  ;;  %2782 = vmatprep.subr.bf16.mxu1 %v2781_v56  ;;  %v2735_v55 = vpack.c.bf16 %v900_v53, %v894_v51  ;;  %v903_v56 = vld [vmem:[#allocation7 + $0x408] sm:$0xff]  ;;  %v942_v51 = vld [vmem:[#allocation7 + $0x540] sm:$0xff]  ;;  %v948_v53 = vld [vmem:[#allocation7 + $0x570] sm:$0xff] }
  0xe8   : > { %v2797_v62 = vpack.c.bf16 %v903_v56, %v897_v54  ;;  %v945_v54 = vld [vmem:[#allocation7 + $0x558] sm:$0xff]  ;;  %v951_v56 = vld [vmem:[#allocation7 + $0x588] sm:$0xff] }
  0xea   : > { %2720 = vmatpush1.bf16.msra.mxu0 %v2719_v4  ;;  %2784 = vmatpush1.bf16.msra.mxu1 %v2783_v5  ;;  %v2737_v4 = vpack.c.bf16 %v913_v2, %v907_v0  ;;  %v906_v5 = vld [vmem:[#allocation7 + $0x420] sm:$0xff]  ;;  %v955_v0 = vld [vmem:[#allocation7 + $0x5a8] sm:$0xff]  ;;  %v961_v2 = vld [vmem:[#allocation7 + $0x5d8] sm:$0xff] }
  0xeb   : > { %2722 = vmatprep.subr.bf16.mxu0 %v2721_v8  ;;  %2786 = vmatprep.subr.bf16.mxu1 %v2785_v9  ;;  %v2739_v8 = vpack.c.bf16 %v912_v6, %v906_v5  ;;  %v915_v9 = vld [vmem:[#allocation7 + $0x468] sm:$0xff]  ;;  %v2753_v5 = vpack.c.bf16 %v961_v2, %v955_v0  ;;  %v960_v6 = vld [vmem:[#allocation7 + $0x5d0] sm:$0xff] }
  0xec   : > { %v2801_v12 = vpack.c.bf16 %v915_v9, %v909_v7  ;;  %v957_v7 = vld [vmem:[#allocation7 + $0x5b8] sm:$0xff] }
  0xee   : > { %2724 = vmatpush1.bf16.msra.mxu0 %v2723_v18  ;;  %2788 = vmatpush1.bf16.msra.mxu1 %v2787_v19  ;;  %v2741_v18 = vpack.c.bf16 %v925_v16, %v919_v14  ;;  %v918_v19 = vld [vmem:[#allocation7 + $0x480] sm:$0xff]  ;;  %v779_v14 = vld [vmem:[#allocation7 + $0x28] sm:$0xff]  ;;  %v785_v16 = vld [vmem:[#allocation7 + $0x58] sm:$0xff] }
  0xef   : > { %2726 = vmatprep.subr.bf16.mxu0 %v2725_v21  ;;  %2790 = vmatprep.subr.bf16.mxu1 %v2789_v24  ;;  %v921_v21 = vld [vmem:[#allocation7 + $0x498] sm:$0xff]  ;;  %v2743_v22 = vpack.c.bf16 %v924_v20, %v918_v19  ;;  %v927_v24 = vld [vmem:[#allocation7 + $0x4c8] sm:$0xff] }
  0xf2   : > { %2728 = vmatpush1.bf16.msra.mxu0 %v2727_v28  ;;  %2792 = vmatpush1.bf16.msra.mxu1 %v2791_v29  ;;  %v2805_v28 = vpack.c.bf16 %v927_v24, %v921_v21  ;;  %v2807_v29 = vpack.c.bf16 %v926_v27, %v920_v26 }
  0xf3   : > { %2730 = vmatprep.subr.bf16.mxu0 %v2729_v32  ;;  %2794 = vmatprep.subr.bf16.mxu1 %v2793_v41  ;;  %v2745_v32 = vpack.c.bf16 %v937_v31, %v931_v30  ;;  %v2809_v41 = vpack.c.bf16 %v939_v38, %v933_v36  ;;  %v670_v30 = vlaneseq }
  0xf6   : > { %2732 = vmatpush1.bf16.msra.mxu0 %v2731_v37  ;;  %2796 = vmatpush1.bf16.msra.mxu1 %v2795_v42  ;;  %v2747_v37 = vpack.c.bf16 %v936_v35, %v930_v34  ;;  %v2811_v42 = vpack.c.bf16 %v938_v40, %v932_v39  ;;  %v3725_v35 = vshrl.u32 %v670_v30, 7  ;;  %v803_v30 = vld [vmem:[#allocation7 + $0xe8] sm:$0xff] }
  0xf7   : > { %2734 = vmatprep.subr.bf16.mxu0 %v2733_v49  ;;  %2798 = vmatprep.subr.bf16.mxu1 %v2797_v62  ;;  %v2749_v49 = vpack.c.bf16 %v949_v48, %v943_v47  ;;  %v2813_v62 = vpack.c.bf16 %v951_v56, %v945_v54  ;;  %v778_v48 = vld [vmem:[#allocation7 + $0x20] sm:$0xff] }
  0xf8   : > { %v3728_v38 = vsub.s32 0, %v3725_v35  ;;  %v3731_v39 = vsub.s32 1, %v3725_v35 }
  0xfa   : > { %2736 = vmatpush1.bf16.msra.mxu0 %v2735_v55  ;;  %2800 = vmatpush1.bf16.msra.mxu1 %v2799_v63  ;;  %v2751_v55 = vpack.c.bf16 %v948_v53, %v942_v51  ;;  %v2815_v63 = vpack.c.bf16 %v950_v61, %v944_v60 }
  0xfb   : > { %2738 = vmatprep.subr.bf16.mxu0 %v2737_v4  ;;  %2802 = vmatprep.subr.bf16.mxu1 %v2801_v12  ;;  %v954_v4 = vld [vmem:[#allocation7 + $0x5a0] sm:$0xff] }
  0xfc   : > { %v2755_v9 = vpack.c.bf16 %v960_v6, %v954_v4  ;;  %v962_v12 = vld [vmem:[#allocation7 + $0x5e0] sm:$0xff] }
  0xfe   : > { %2740 = vmatpush1.bf16.msra.mxu0 %v2739_v8  ;;  %2804 = vmatpush1.bf16.msra.mxu1 %v2803_v13  ;;  %v963_v8 = vld [vmem:[#allocation7 + $0x5e8] sm:$0xff]  ;;  %v2819_v13 = vpack.c.bf16 %v962_v12, %v956_v11 }
  0xff   : > { %2742 = vmatprep.subr.bf16.mxu0 %v2741_v18  ;;  %2806 = vmatprep.subr.bf16.mxu1 %v2805_v28  ;;  %v2817_v10 = vpack.c.bf16 %v963_v8, %v957_v7  ;;  %v2821_v18 = vpack.c.bf16 %v785_v16, %v779_v14  ;;  %v791_v7 = vld [vmem:[#allocation7 + $0x88] sm:$0xff]  ;;  %v797_v8 = vld [vmem:[#allocation7 + $0xb8] sm:$0xff] }
 0x100   : > { %v2825_v16 = vpack.c.bf16 %v797_v8, %v791_v7  ;;  %v820_v7 = vld [vmem:[#allocation7 + $0x170] sm:$0xff] }
 0x102   : > { %2744 = vmatpush1.bf16.msra.mxu0 %v2743_v22  ;;  %2808 = vmatpush1.bf16.msra.mxu1 %v2807_v29 }
 0x103   : > { %2746 = vmatprep.subr.bf16.mxu0 %v2745_v32  ;;  %2810 = vmatprep.subr.bf16.mxu1 %v2809_v41  ;;  %v718_v41 = vld [vmem:[%s4249_s2] sm:$0x3] }
 0x104   : > { %v3744_v51 = vrot.slane %v718_v41, %v3731_v39  ;;  %v3750_v54 = vrot.slane %v718_v41, %v3728_v38 }
 0x106   : > { %2748 = vmatpush1.bf16.msra.mxu0 %v2747_v37  ;;  %2812 = vmatpush1.bf16.msra.mxu1 %v2811_v42  ;;  %v746_v42 = vld [vmem:[%s4250_s3] sm:$0x3] }
 0x107   : > { %2750 = vmatprep.subr.bf16.mxu0 %v2749_v49  ;;  %2814 = vmatprep.subr.bf16.mxu1 %v2813_v62  ;;  %v784_v49 = vld [vmem:[#allocation7 + $0x50] sm:$0xff]  ;;  %v3747_v53 = vrot.slane %v746_v42, %v3731_v39  ;;  %v3755_v60 = vrot.slane %v746_v42, %v3728_v38 }
 0x108   : > { %v2823_v61 = vpack.c.bf16 %v784_v49, %v778_v48  ;;  %v802_v49 = vld [vmem:[#allocation7 + $0xe0] sm:$0xff] }
 0x10a   : > { %2752 = vmatpush1.bf16.msra.mxu0 %v2751_v55  ;;  %2816 = vmatpush1.bf16.msra.mxu1 %v2815_v63 }
 0x10b   : > { %2754 = vmatprep.subr.bf16.mxu0 %v2753_v5  ;;  %2818 = vmatprep.subr.bf16.mxu1 %v2817_v10 }
 0x10e   : > { %2756 = vmatpush1.bf16.msra.mxu0 %v2755_v9  ;;  %2820 = vmatpush1.bf16.msra.mxu1 %v2819_v13 }
 0x10f   : > { %2822 = vmatprep.subr.bf16.mxu0 %v2821_v18 }
 0x1a4   : > { %v582_v19 = vpop.f32.mrb[0].mxu0  ;;  %v655_v20 = vpop.f32.mrb[0].mxu1 }
 0x1a5   : > { %v587_v21 = vmul.f32 0.001953125, %v582_v19  ;;  %v584_v22 = vpop.f32.mrb[1].mxu0  ;;  %v660_v24 = vmul.f32 0.001953125, %v655_v20  ;;  %v657_v26 = vpop.f32.mrb[1].mxu1 }
 0x1a6   : > { %v588_v27 = vmul.f32 0.001953125, %v584_v22  ;;  %v661_v28 = vmul.f32 0.001953125, %v657_v26 }
 0x1a7   : > { %v662_v29 = vmul.f32 %v587_v21, %v587_v21  ;;  %v3734_v40 = vrot.slane %v587_v21, %v3728_v38 }
 0x1a8   : > { %v663_v31 = vmul.f32 %v588_v27, %v588_v27  ;;  %v677_v47 = vrot.slane %v588_v27, %v3728_v38 }
 0x1a9   : > { %v664_v32 = vsub.f32 %v660_v24, %v662_v29  ;;  %v678_v56 = vsub.f32 %v3654_v57, %v3734_v40  ;;  %v680_v62 = vsub.f32 %v3657_v58, %v3734_v40  ;;  %v682_v4 = vsub.f32 %v3660_v59, %v3734_v40  ;;  %v796_v29 = vld [vmem:[#allocation7 + $0xb0] sm:$0xff] }
 0x1aa   : > { %v665_v34 = vsub.f32 %v661_v28, %v663_v31  ;;  %v679_v2 = vsub.f32 %v3630_v43, %v677_v47  ;;  %v684_v5 = vsub.f32 %v3671_v3, %v3734_v40  ;;  %v681_v6 = vsub.f32 %v3633_v44, %v677_v47  ;;  %v790_v28 = vld [vmem:[#allocation7 + $0x80] sm:$0xff] }
 0x1ab   : > { %v666_v36 = vadd.f32 1e-05, %v664_v32  ;;  %v683_v58 = vsub.f32 %v3636_v45, %v677_v47  ;;  %v685_v9 = vsub.f32 %v3639_v46, %v677_v47  ;;  %v687_v18 = vsub.f32 %v3648_v52, %v677_v47 }
 0x1ac   : > { %v667_v37 = vadd.f32 1e-05, %v665_v34  ;;  %v686_v45 = vsub.f32 %v3685_v17, %v3734_v40  ;;  %v689_v20 = vsub.f32 %v3667_v1, %v677_v47  ;;  %v688_v21 = vsub.f32 %v3697_v25, %v3734_v40 }
 0x1ad   : > { %3096 = vrsqrt.f32 %v666_v36  ;;  %v691_v24 = vsub.f32 %v3681_v15, %v677_v47  ;;  %v690_v26 = vsub.f32 %v3706_v33, %v3734_v40  ;;  %v693_v52 = vsub.f32 %v3693_v23, %v677_v47  ;;  %v809_v15 = vld [vmem:[#allocation7 + $0x118] sm:$0xff] }
 0x1ae   : > { %3098 = vrsqrt.f32 %v667_v37  ;;  %v2827_v41 = vpack.c.bf16 %v796_v29, %v790_v28  ;;  %v2829_v42 = vpack.c.bf16 %v809_v15, %v803_v30  ;;  %v850_v15 = vld [vmem:[#allocation7 + $0x260] sm:$0xff] }
 0x1b7   : > { %v3097_v55 = vpop.eup %3096 }
 0x1b8   : > { %v3099_v63 = vpop.eup %3098  ;;  %v3760_v0 = vrot.slane %v3097_v55, %v3728_v38  ;;  %v808_v55 = vld [vmem:[#allocation7 + $0x110] sm:$0xff] }
 0x1b9   : > { %v701_v57 = vrot.slane %v3099_v63, %v3728_v38  ;;  %v815_v63 = vld [vmem:[#allocation7 + $0x148] sm:$0xff] }
 0x1ba   : > { %v702_v10 = vmul.f32 %v3760_v0, %v678_v56  ;;  %v704_v43 = vmul.f32 %v3760_v0, %v680_v62  ;;  %v706_v11 = vmul.f32 %v3760_v0, %v682_v4  ;;  %v708_v59 = vmul.f32 %v3760_v0, %v684_v5 }
 0x1bb   : > { %v703_v12 = vmul.f32 %v701_v57, %v679_v2  ;;  %v705_v3 = vmul.f32 %v701_v57, %v681_v6  ;;  %v707_v13 = vmul.f32 %v701_v57, %v683_v58  ;;  %v709_v14 = vmul.f32 %v701_v57, %v685_v9  ;;  %v821_v2 = vld [vmem:[#allocation7 + $0x178] sm:$0xff]  ;;  %v814_v6 = vld [vmem:[#allocation7 + $0x140] sm:$0xff]  ;;  %v827_v58 = vld [vmem:[#allocation7 + $0x1a8] sm:$0xff] }
 0x1bc   : > { %v730_v44 = vmul.f32 %v3750_v54, %v702_v10  ;;  %v732_v22 = vmul.f32 %v3750_v54, %v704_v43  ;;  %v711_v31 = vmul.f32 %v701_v57, %v687_v18  ;;  %v710_v33 = vmul.f32 %v3760_v0, %v686_v45  ;;  %v833_v9 = vld [vmem:[#allocation7 + $0x1d8] sm:$0xff] }
 0x1bd   : > { %v731_v46 = vmul.f32 %v3744_v51, %v703_v12  ;;  %v733_v19 = vmul.f32 %v3744_v51, %v705_v3  ;;  %v735_v25 = vmul.f32 %v3744_v51, %v707_v13  ;;  %v713_v32 = vmul.f32 %v701_v57, %v689_v20  ;;  %v826_v12 = vld [vmem:[#allocation7 + $0x1a0] sm:$0xff]  ;;  %v832_v3 = vld [vmem:[#allocation7 + $0x1d0] sm:$0xff] }
 0x1be   : > { %v3793_v27 = vadd.f32 %v3755_v60, %v730_v44  ;;  %v3801_v23 = vmul.f32 %v3760_v0, %v688_v21  ;;  %v3805_v34 = vmul.f32 %v701_v57, %v691_v24  ;;  %v3808_v36 = vmul.f32 %v3760_v0, %v690_v26  ;;  %v839_v44 = vld [vmem:[#allocation7 + $0x208] sm:$0xff]  ;;  %v838_v20 = vld [vmem:[#allocation7 + $0x200] sm:$0xff]  ;;  %v844_v21 = vld [vmem:[#allocation7 + $0x230] sm:$0xff] }
 0x1bf   : > { %v3790_v17 = vadd.f32 %v3747_v53, %v731_v46  ;;  %v3796_v1 = vadd.f32 %v3747_v53, %v733_v19  ;;  %v3810_v37 = vmul.f32 %v701_v57, %v693_v52  ;;  %v3817_v47 = vadd.f32 %v3755_v60, %v732_v22  ;;  %v851_v26 = vld [vmem:[#allocation7 + $0x268] sm:$0xff]  ;;  %v857_v52 = vld [vmem:[#allocation7 + $0x298] sm:$0xff] }
 0x1c0   : > { %v734_v48 = vmul.f32 %v3750_v54, %v706_v11  ;;  %v692_v56 = vsub.f32 %v3717_v50, %v3734_v40  ;;  %v3823_v62 = vadd.f32 %v3747_v53, %v735_v25  ;;  %v2831_v5 = vpack.c.bf16 %v808_v55, %v802_v49  ;;  %v875_v55 = vld [vmem:[#allocation7 + $0x328] sm:$0xff] }
 0x1c1   : > { %1062 = vmatprep.mubr.f32.mxu0 %v3790_v17  ;;  %1175 = vmatprep.mubr.f32.mxu1 %v3790_v17  ;;  %v2833_v40 = vpack.c.bf16 %v821_v2, %v815_v63  ;;  %v736_v57 = vmul.f32 %v3750_v54, %v708_v59  ;;  %v2835_v10 = vpack.c.bf16 %v820_v7, %v814_v6  ;;  %v874_v2 = vld [vmem:[#allocation7 + $0x320] sm:$0xff]  ;;  %v892_v7 = vld [vmem:[#allocation7 + $0x3b0] sm:$0xff] }
 0x1c2   : > { %1063 = vmatmul.mubr.f32.vlgmr.msra.gmra.mrb[2].mxu0 %v3793_v27  ;;  %1176 = vmatmul.mubr.f32.vlgmr.msra.gmra.mrb[2].mxu1 %v3793_v27  ;;  %v3829_v4 = vmul.f32 %v3760_v0, %v692_v56  ;;  %v3834_v50 = vadd.f32 %v3755_v60, %v734_v48  ;;  %v739_v0 = vmul.f32 %v3744_v51, %v711_v31  ;;  %v856_v31 = vld [vmem:[#allocation7 + $0x290] sm:$0xff]  ;;  %v881_v56 = vld [vmem:[#allocation7 + $0x358] sm:$0xff]  ;;  %v886_v6 = vld [vmem:[#allocation7 + $0x380] sm:$0xff] }
 0x1c3   : > { %2824 = vmatpush1.bf16.msra.mxu0 %v2823_v61  ;;  %1068 = vmatprep.mubr.f32.mxu0 %v3796_v1  ;;  %v737_v61 = vmul.f32 %v3744_v51, %v709_v14  ;;  %v3846_v43 = vadd.f32 %v3755_v60, %v736_v57  ;;  %v2837_v11 = vpack.c.bf16 %v833_v9, %v827_v58  ;;  %v868_v48 = vld [vmem:[#allocation7 + $0x2f0] sm:$0xff] }
 0x1c4   : > { %1181 = vmatprep.mubr.f32.mxu1 %v3796_v1  ;;  %2826 = vmatprep.subr.bf16.mxu0 %v2825_v16  ;;  %v738_v59 = vmul.f32 %v3750_v54, %v710_v33  ;;  %v3850_v13 = vadd.f32 %v3747_v53, %v739_v0  ;;  %v741_v14 = vmul.f32 %v3744_v51, %v713_v32  ;;  %v845_v16 = vld [vmem:[#allocation7 + $0x238] sm:$0xff]  ;;  %v899_v0 = vld [vmem:[#allocation7 + $0x3e8] sm:$0xff] }
 0x1c5   : > { %v3838_v8 = vadd.f32 %v3747_v53, %v737_v61  ;;  %v2839_v18 = vpack.c.bf16 %v832_v3, %v826_v12  ;;  %v2841_v46 = vpack.c.bf16 %v845_v16, %v839_v44  ;;  %v740_v19 = vmul.f32 %v3750_v54, %v3801_v23  ;;  %v863_v23 = vld [vmem:[#allocation7 + $0x2c8] sm:$0xff]  ;;  %v917_v12 = vld [vmem:[#allocation7 + $0x478] sm:$0xff]  ;;  %v910_v44 = vld [vmem:[#allocation7 + $0x440] sm:$0xff] }
 0x1c6   : > { %1069 = vmatmul.mubr.f32.gmra.mrb[4].mxu0 %v3817_v47  ;;  %1182 = vmatmul.mubr.f32.gmra.mrb[4].mxu1 %v3817_v47  ;;  %v3858_v45 = vadd.f32 %v3755_v60, %v738_v59  ;;  %v3863_v22 = vadd.f32 %v3747_v53, %v741_v14  ;;  %v743_v24 = vmul.f32 %v3744_v51, %v3805_v34  ;;  %v869_v34 = vld [vmem:[#allocation7 + $0x2f8] sm:$0xff]  ;;  %v911_v59 = vld [vmem:[#allocation7 + $0x448] sm:$0xff]  ;;  %v916_v16 = vld [vmem:[#allocation7 + $0x470] sm:$0xff] }
 0x1c7   : > { %2828 = vmatpush1.bf16.msra.mxu0 %v2827_v41  ;;  %1074 = vmatprep.mubr.f32.mxu0 %v3823_v62  ;;  %v2843_v28 = vpack.c.bf16 %v844_v21, %v838_v20  ;;  %v3872_v25 = vadd.f32 %v3755_v60, %v740_v19  ;;  %v2845_v29 = vpack.c.bf16 %v857_v52, %v851_v26  ;;  %v922_v21 = vld [vmem:[#allocation7 + $0x4a0] sm:$0xff]  ;;  %v935_v26 = vld [vmem:[#allocation7 + $0x508] sm:$0xff]  ;;  %v941_v52 = vld [vmem:[#allocation7 + $0x538] sm:$0xff] }
 0x1c8   : > { %1187 = vmatprep.mubr.f32.mxu1 %v3823_v62  ;;  %2830 = vmatprep.subr.bf16.mxu0 %v2829_v42  ;;  %v742_v30 = vmul.f32 %v3750_v54, %v3808_v36  ;;  %v3877_v33 = vadd.f32 %v3747_v53, %v743_v24  ;;  %v745_v32 = vmul.f32 %v3744_v51, %v3810_v37  ;;  %v862_v37 = vld [vmem:[#allocation7 + $0x2c0] sm:$0xff]  ;;  %v928_v24 = vld [vmem:[#allocation7 + $0x4d0] sm:$0xff] }
 0x1c9   : > { %v2847_v41 = vpack.c.bf16 %v856_v31, %v850_v15  ;;  %v2849_v42 = vpack.c.bf16 %v869_v34, %v863_v23  ;;  %v744_v51 = vmul.f32 %v3750_v54, %v3829_v4  ;;  %v2851_v61 = vpack.c.bf16 %v868_v48, %v862_v37  ;;  %v887_v4 = vld [vmem:[#allocation7 + $0x388] sm:$0xff]  ;;  %v940_v15 = vld [vmem:[#allocation7 + $0x530] sm:$0xff]  ;;  %v965_v37 = vld [vmem:[#allocation7 + $0x5f8] sm:$0xff] }
 0x1ca   : > { %1075 = vmatmul.mubr.f32.gmra.mrb[6].mxu0 %v3834_v50  ;;  %1188 = vmatmul.mubr.f32.gmra.mrb[6].mxu1 %v3834_v50  ;;  %v3886_v36 = vadd.f32 %v3755_v60, %v742_v30  ;;  %v3891_v49 = vadd.f32 %v3747_v53, %v745_v32  ;;  %v2853_v63 = vpack.c.bf16 %v881_v56, %v875_v55  ;;  %v880_v53 = vld [vmem:[#allocation7 + $0x350] sm:$0xff]  ;;  %v934_v30 = vld [vmem:[#allocation7 + $0x500] sm:$0xff]  ;;  %v947_v31 = vld [vmem:[#allocation7 + $0x568] sm:$0xff] }
 0x1cb   : > { %2832 = vmatpush1.bf16.msra.mxu0 %v2831_v5  ;;  %1080 = vmatprep.mubr.f32.mxu0 %v3838_v8  ;;  %v3898_v54 = vadd.f32 %v3755_v60, %v744_v51  ;;  %v893_v5 = vld [vmem:[#allocation7 + $0x3b8] sm:$0xff]  ;;  %v2859_v58 = vpack.c.bf16 %v892_v7, %v886_v6  ;;  %v2865_v14 = vpack.c.bf16 %v917_v12, %v911_v59  ;;  %v959_v51 = vld [vmem:[#allocation7 + $0x5c8] sm:$0xff]  ;;  %v958_v56 = vld [vmem:[#allocation7 + $0x5c0] sm:$0xff] }
 0x1cc   : > { %1193 = vmatprep.mubr.f32.mxu1 %v3838_v8  ;;  %2834 = vmatprep.subr.bf16.mxu0 %v2833_v40  ;;  %v2855_v40 = vpack.c.bf16 %v880_v53, %v874_v2  ;;  %v2857_v57 = vpack.c.bf16 %v893_v5, %v887_v4  ;;  %v905_v60 = vld [vmem:[#allocation7 + $0x418] sm:$0xff]  ;;  %v2867_v19 = vpack.c.bf16 %v916_v16, %v910_v44  ;;  %v3921_v2 = vld [vmem:[%s4252_s5] sm:$0x3f]  ;;  %v978_v53 = vsub.s32 2, %v3725_v35 }
 0x1cd   : > { %v2861_v9 = vpack.c.bf16 %v905_v60, %v899_v0  ;;  %v953_v32 = vld [vmem:[#allocation7 + $0x598] sm:$0xff]  ;;  %v2875_v23 = vpack.c.bf16 %v940_v15, %v934_v30  ;;  %v2881_v55 = vpack.c.bf16 %v965_v37, %v959_v51  ;;  %v982_v4 = vsub.s32 3, %v3725_v35 }
 0x1ce   : > { %1081 = vmatmul.mubr.f32.gmra.mrb[8].mxu0 %v3846_v43  ;;  %1194 = vmatmul.mubr.f32.gmra.mrb[8].mxu1 %v3846_v43  ;;  %v2877_v34 = vpack.c.bf16 %v953_v32, %v947_v31  ;;  %v3927_v5 = vrot.slane %v3921_v2, %v3728_v38 }
 0x1cf   : > { %2836 = vmatpush1.bf16.msra.mxu0 %v2835_v10  ;;  %1086 = vmatprep.mubr.f32.mxu0 %v3850_v13  ;;  %v898_v10 = vld [vmem:[#allocation7 + $0x3e0] sm:$0xff]  ;;  %v3937_v0 = vrot.slane %v3921_v2, %v982_v4 }
 0x1d0   : > { %1199 = vmatprep.mubr.f32.mxu1 %v3850_v13  ;;  %2838 = vmatprep.subr.bf16.mxu0 %v2837_v11  ;;  %v904_v11 = vld [vmem:[#allocation7 + $0x410] sm:$0xff] }
 0x1d1   : > { %v2863_v3 = vpack.c.bf16 %v904_v11, %v898_v10 }
 0x1d2   : > { %1087 = vmatmul.mubr.f32.gmra.mrb[10].mxu0 %v3858_v45  ;;  %1200 = vmatmul.mubr.f32.gmra.mrb[10].mxu1 %v3858_v45 }
 0x1d3   : > { %2840 = vmatpush1.bf16.msra.mxu0 %v2839_v18  ;;  %1092 = vmatprep.mubr.f32.mxu0 %v3863_v22  ;;  %v923_v18 = vld [vmem:[#allocation7 + $0x4a8] sm:$0xff] }
 0x1d4   : > { %1205 = vmatprep.mubr.f32.mxu1 %v3863_v22  ;;  %2842 = vmatprep.subr.bf16.mxu0 %v2841_v46  ;;  %v929_v46 = vld [vmem:[#allocation7 + $0x4d8] sm:$0xff] }
 0x1d5   : > { %v2869_v20 = vpack.c.bf16 %v929_v46, %v923_v18 }
 0x1d6   : > { %1093 = vmatmul.mubr.f32.gmra.mrb[12].mxu0 %v3872_v25  ;;  %1206 = vmatmul.mubr.f32.gmra.mrb[12].mxu1 %v3872_v25 }
 0x1d7   : > { %2844 = vmatpush1.bf16.msra.mxu0 %v2843_v28  ;;  %1098 = vmatprep.mubr.f32.mxu0 %v3877_v33  ;;  %v2871_v28 = vpack.c.bf16 %v928_v24, %v922_v21 }
 0x1d8   : > { %1211 = vmatprep.mubr.f32.mxu1 %v3877_v33  ;;  %2846 = vmatprep.subr.bf16.mxu0 %v2845_v29  ;;  %v2873_v29 = vpack.c.bf16 %v941_v52, %v935_v26 }
 0x1da   : > { %1099 = vmatmul.mubr.f32.gmra.mrb[14].mxu0 %v3886_v36  ;;  %1212 = vmatmul.mubr.f32.gmra.mrb[14].mxu1 %v3886_v36 }
 0x1db   : > { %2848 = vmatpush1.bf16.msra.mxu0 %v2847_v41  ;;  %1104 = vmatprep.mubr.f32.mxu0 %v3891_v49  ;;  %v946_v41 = vld [vmem:[#allocation7 + $0x560] sm:$0xff] }
 0x1dc   : > { %1217 = vmatprep.mubr.f32.mxu1 %v3891_v49  ;;  %2850 = vmatprep.subr.bf16.mxu0 %v2849_v42  ;;  %v952_v42 = vld [vmem:[#allocation7 + $0x590] sm:$0xff] }
 0x1dd   : > { %v2879_v48 = vpack.c.bf16 %v952_v42, %v946_v41 }
 0x1de   : > { %1105 = vmatmul.mubr.f32.gmra.mrb[16].mxu0 %v3898_v54  ;;  %1218 = vmatmul.mubr.f32.gmra.mrb[16].mxu1 %v3898_v54 }
 0x1df   : > { %2852 = vmatpush1.bf16.msra.mxu0 %v2851_v61  ;;  %1288 = vmatprep.mubr.f32.mxu0 %v3790_v17  ;;  %v964_v61 = vld [vmem:[#allocation7 + $0x5f0] sm:$0xff] }
 0x1e0   : > { %2854 = vmatprep.subr.bf16.mxu0 %v2853_v63  ;;  %v2883_v63 = vpack.c.bf16 %v964_v61, %v958_v56 }
 0x1e3   : > { %2856 = vmatpush1.bf16.msra.mxu0 %v2855_v40  ;;  %v3931_v40 = vrot.slane %v3921_v2, %v3731_v39 }
 0x1e4   : > { %2858 = vmatprep.subr.bf16.mxu0 %v2857_v57  ;;  %v3934_v57 = vrot.slane %v3921_v2, %v978_v53 }
 0x1e7   : > { %2860 = vmatpush1.bf16.msra.mxu0 %v2859_v58 }
 0x1e8   : > { %2862 = vmatprep.subr.bf16.mxu0 %v2861_v9 }
 0x1eb   : > { %2864 = vmatpush1.bf16.msra.mxu0 %v2863_v3 }
 0x1ec   : > { %2866 = vmatprep.subr.bf16.mxu0 %v2865_v14 }
 0x1ef   : > { %2868 = vmatpush1.bf16.msra.mxu0 %v2867_v19 }
 0x1f0   : > { %2870 = vmatprep.subr.bf16.mxu0 %v2869_v20 }
 0x1f3   : > { %2872 = vmatpush1.bf16.msra.mxu0 %v2871_v28 }
 0x1f4   : > { %2874 = vmatprep.subr.bf16.mxu0 %v2873_v29 }
 0x1f7   : > { %2876 = vmatpush1.bf16.msra.mxu0 %v2875_v23 }
 0x1f8   : > { %2878 = vmatprep.subr.bf16.mxu0 %v2877_v34 }
 0x1fb   : > { %2880 = vmatpush1.bf16.msra.mxu0 %v2879_v48 }
 0x1fc   : > { %2882 = vmatprep.subr.bf16.mxu0 %v2881_v55 }
 0x1ff   : > { %2884 = vmatpush1.bf16.msra.mxu0 %v2883_v63 }
 0x202   : > { %1289 = vmatmul.mubr.f32.vlgmr.msra.gmra.mrb[18].mxu0 %v3793_v27 }
 0x203   : > { %1294 = vmatprep.mubr.f32.mxu0 %v3796_v1 }
 0x206   : > { %1295 = vmatmul.mubr.f32.gmra.mrb[20].mxu0 %v3817_v47 }
 0x207   : > { %1300 = vmatprep.mubr.f32.mxu0 %v3823_v62 }
 0x20a   : > { %1301 = vmatmul.mubr.f32.gmra.mrb[22].mxu0 %v3834_v50 }
 0x20b   : > { %1306 = vmatprep.mubr.f32.mxu0 %v3838_v8 }
 0x20e   : > { %1307 = vmatmul.mubr.f32.gmra.mrb[24].mxu0 %v3846_v43 }
 0x20f   : > { %1312 = vmatprep.mubr.f32.mxu0 %v3850_v13 }
 0x212   : > { %1313 = vmatmul.mubr.f32.gmra.mrb[26].mxu0 %v3858_v45 }
 0x213   : > { %1318 = vmatprep.mubr.f32.mxu0 %v3863_v22 }
 0x216   : > { %1319 = vmatmul.mubr.f32.gmra.mrb[28].mxu0 %v3872_v25 }
 0x217   : > { %1324 = vmatprep.mubr.f32.mxu0 %v3877_v33 }
 0x21a   : > { %1325 = vmatmul.mubr.f32.gmra.mrb[30].mxu0 %v3886_v36 }
 0x21b   : > { %1330 = vmatprep.mubr.f32.mxu0 %v3891_v49 }
 0x21e   : > { %1331 = vmatmul.mubr.f32.gmra.mrb[32].mxu0 %v3898_v54 }
 0x295   : > { %v1064_v6 = vpop.f32.mrb[2].mxu0  ;;  %v1177_v7 = vpop.f32.mrb[2].mxu1 }
 0x296   : > { %v1065_v60 = vadd.f32 %v1064_v6, %v3927_v5  ;;  %v1066_v58 = vpop.f32.mrb[3].mxu0  ;;  %v1179_v9 = vpop.f32.mrb[3].mxu1  ;;  %v1178_v59 = vadd.f32 %v1177_v7, %v3934_v57 }
 0x297   : > { %v1067_v10 = vadd.f32 %v1066_v58, %v3931_v40  ;;  %v1180_v3 = vadd.f32 %v1179_v9, %v3937_v0 }
 0x298   : > { %v1337_v11 = vmul.f32 0.29730177, %v1065_v60  ;;  %v1345_v20 = vmul.f32 0.29730177, %v1178_v59 }
 0x299   : > { %v1676_v12 = vmul.f32 0.29730177, %v1067_v10  ;;  %v3943_v14 = vpop.f32.mrb[4].mxu0  ;;  %v1183_v44 = vpop.f32.mrb[4].mxu1  ;;  %v1684_v24 = vmul.f32 0.29730177, %v1180_v3 }
 0x29a   : > { %v1184_v16 = vadd.f32 %v1183_v44, %v3934_v57  ;;  %v3946_v18 = vpop.f32.mrb[5].mxu0  ;;  %v1185_v46 = vpop.f32.mrb[5].mxu1  ;;  %2469 = vmatprep.mubr.f32.mxu1 %v1337_v11 }
 0x29b   : > { %v1186_v19 = vadd.f32 %v1185_v46, %v3937_v0  ;;  %2525 = vmatprep.mubr.f32.mxu0 %v1676_v12 }
 0x29c   : > { %v1346_v21 = vmul.f32 0.29730177, %v1184_v16 }
 0x29d   : > { %v1685_v26 = vmul.f32 0.29730177, %v1186_v19  ;;  %v3949_v52 = vpop.f32.mrb[6].mxu0  ;;  %v1189_v28 = vpop.f32.mrb[6].mxu1 }
 0x29e   : > { %v2885_v29 = vpack.c.bf16 %v1346_v21, %v1345_v20  ;;  %v3951_v30 = vpop.f32.mrb[7].mxu0  ;;  %v1191_v15 = vpop.f32.mrb[7].mxu1  ;;  %v1190_v32 = vadd.f32 %v1189_v28, %v3934_v57 }
 0x29f   : > { %v2917_v31 = vpack.c.bf16 %v1685_v26, %v1684_v24  ;;  %v1192_v23 = vadd.f32 %v1191_v15, %v3937_v0 }
 0x2a0   : > { %2886 = vmatprep.subr.bf16.mxu1 %v2885_v29  ;;  %v1347_v55 = vmul.f32 0.29730177, %v1190_v32 }
 0x2a1   : > { %v3955_v34 = vpop.f32.mrb[8].mxu0  ;;  %v1195_v41 = vpop.f32.mrb[8].mxu1  ;;  %2888 = vmatpush3.bf16.xpose.msra.mxu1 %v2885_v29  ;;  %2918 = vmatprep.subr.bf16.mxu0 %v2917_v31  ;;  %v1686_v61 = vmul.f32 0.29730177, %v1192_v23 }
 0x2a2   : > { %v1196_v42 = vadd.f32 %v1195_v41, %v3934_v57  ;;  %v3958_v51 = vpop.f32.mrb[9].mxu0  ;;  %v1197_v37 = vpop.f32.mrb[9].mxu1  ;;  %2920 = vmatpush3.bf16.xpose.msra.mxu0 %v2917_v31 }
 0x2a3   : > { %v1198_v48 = vadd.f32 %v1197_v37, %v3937_v0 }
 0x2a4   : > { %v1348_v56 = vmul.f32 0.29730177, %v1196_v42 }
 0x2a5   : > { %v1687_v63 = vmul.f32 0.29730177, %v1198_v48  ;;  %v1088_v53 = vpop.f32.mrb[10].mxu0  ;;  %v1201_v4 = vpop.f32.mrb[10].mxu1 }
 0x2a6   : > { %v2889_v6 = vpack.c.bf16 %v1348_v56, %v1347_v55  ;;  %v1090_v7 = vpop.f32.mrb[11].mxu0  ;;  %v1203_v60 = vpop.f32.mrb[11].mxu1  ;;  %v1202_v9 = vadd.f32 %v1201_v4, %v3934_v57 }
 0x2a7   : > { %v2921_v58 = vpack.c.bf16 %v1687_v63, %v1686_v61  ;;  %v1204_v10 = vadd.f32 %v1203_v60, %v3937_v0 }
 0x2a8   : > { %2890 = vmatprep.subr.bf16.mxu1 %v2889_v6  ;;  %v1349_v46 = vmul.f32 0.29730177, %v1202_v9  ;;  %v1071_v9 = vadd.f32 %v3943_v14, %v3927_v5  ;;  %v1089_v14 = vadd.f32 %v1088_v53, %v3927_v5 }
 0x2a9   : > { %v1094_v11 = vpop.f32.mrb[12].mxu0  ;;  %v1207_v59 = vpop.f32.mrb[12].mxu1  ;;  %2892 = vmatpush3.bf16.xpose.msra.mxu1 %v2889_v6  ;;  %2922 = vmatprep.subr.bf16.mxu0 %v2921_v58  ;;  %v1688_v20 = vmul.f32 0.29730177, %v1204_v10  ;;  %v1077_v10 = vadd.f32 %v3949_v52, %v3927_v5 }
 0x2aa   : > { %v1208_v12 = vadd.f32 %v1207_v59, %v3934_v57  ;;  %v1096_v3 = vpop.f32.mrb[13].mxu0  ;;  %v1209_v44 = vpop.f32.mrb[13].mxu1  ;;  %2924 = vmatpush3.bf16.xpose.msra.mxu0 %v2921_v58  ;;  %v1338_v59 = vmul.f32 0.29730177, %v1071_v9 }
 0x2ab   : > { %v1210_v16 = vadd.f32 %v1209_v44, %v3937_v0 }
 0x2ac   : > { %v1350_v19 = vmul.f32 0.29730177, %v1208_v12  ;;  %v1083_v12 = vadd.f32 %v3955_v34, %v3927_v5  ;;  %v1097_v34 = vadd.f32 %v1096_v3, %v3931_v40 }
 0x2ad   : > { %v1689_v21 = vmul.f32 0.29730177, %v1210_v16  ;;  %v1100_v24 = vpop.f32.mrb[14].mxu0  ;;  %v1213_v26 = vpop.f32.mrb[14].mxu1  ;;  %v1339_v16 = vmul.f32 0.29730177, %v1077_v10 }
 0x2ae   : > { %v2893_v28 = vpack.c.bf16 %v1350_v19, %v1349_v46  ;;  %v1102_v29 = vpop.f32.mrb[15].mxu0  ;;  %v1215_v15 = vpop.f32.mrb[15].mxu1  ;;  %v1214_v32 = vadd.f32 %v1213_v26, %v3934_v57  ;;  %v1085_v46 = vadd.f32 %v3958_v51, %v3931_v40  ;;  %v1340_v52 = vmul.f32 0.29730177, %v1083_v12 }
 0x2af   : > { %v2925_v31 = vpack.c.bf16 %v1689_v21, %v1688_v20  ;;  %v1216_v23 = vadd.f32 %v1215_v15, %v3937_v0  ;;  %v1341_v21 = vmul.f32 0.29730177, %v1089_v14  ;;  %v1101_v26 = vadd.f32 %v1100_v24, %v3927_v5 }
 0x2b0   : > { %2894 = vmatprep.subr.bf16.mxu1 %v2893_v28  ;;  %v1351_v61 = vmul.f32 0.29730177, %v1214_v32  ;;  %v1679_v20 = vmul.f32 0.29730177, %v1085_v46  ;;  %v1103_v51 = vadd.f32 %v1102_v29, %v3931_v40  ;;  %v1681_v15 = vmul.f32 0.29730177, %v1097_v34 }
 0x2b1   : > { %v1106_v41 = vpop.f32.mrb[16].mxu0  ;;  %v1219_v42 = vpop.f32.mrb[16].mxu1  ;;  %2896 = vmatpush3.bf16.xpose.msra.mxu1 %v2893_v28  ;;  %2926 = vmatprep.subr.bf16.mxu0 %v2925_v31  ;;  %v1690_v4 = vmul.f32 0.29730177, %v1216_v23  ;;  %v986_v29 = vsub.s32 4, %v3725_v35  ;;  %v990_v23 = vsub.s32 5, %v3725_v35 }
 0x2b2   : > { %v1220_v37 = vadd.f32 %v1219_v42, %v3934_v57  ;;  %v1108_v48 = vpop.f32.mrb[17].mxu0  ;;  %v1221_v55 = vpop.f32.mrb[17].mxu1  ;;  %2928 = vmatpush3.bf16.xpose.msra.mxu0 %v2925_v31  ;;  %v1073_v57 = vadd.f32 %v3946_v18, %v3931_v40  ;;  %v1091_v18 = vadd.f32 %v1090_v7, %v3931_v40  ;;  %v1107_v7 = vadd.f32 %v1106_v41, %v3927_v5 }
 0x2b3   : > { %v1222_v56 = vadd.f32 %v1221_v55, %v3937_v0  ;;  %v1079_v0 = vadd.f32 %v3951_v30, %v3931_v40  ;;  %v1095_v30 = vadd.f32 %v1094_v11, %v3927_v5  ;;  %v1343_v31 = vmul.f32 0.29730177, %v1101_v26 }
 0x2b4   : > { %v1352_v63 = vmul.f32 0.29730177, %v1220_v37  ;;  %v1677_v44 = vmul.f32 0.29730177, %v1073_v57  ;;  %v1680_v28 = vmul.f32 0.29730177, %v1091_v18  ;;  %v1109_v11 = vadd.f32 %v1108_v48, %v3931_v40 }
 0x2b5   : > { %v1691_v6 = vmul.f32 0.29730177, %v1222_v56  ;;  %v1678_v19 = vmul.f32 0.29730177, %v1079_v0  ;;  %v1342_v53 = vmul.f32 0.29730177, %v1095_v30  ;;  %v987_v5 = vrot.slane %v3921_v2, %v986_v29 }
 0x2b6   : > { %v2897_v60 = vpack.c.bf16 %v1352_v63, %v1351_v61  ;;  %v1682_v32 = vmul.f32 0.29730177, %v1103_v51  ;;  %v1344_v3 = vmul.f32 0.29730177, %v1107_v7  ;;  %v1683_v24 = vmul.f32 0.29730177, %v1109_v11 }
 0x2b7   : > { %v2929_v58 = vpack.c.bf16 %v1691_v6, %v1690_v4  ;;  %v991_v37 = vrot.slane %v3921_v2, %v990_v23 }
 0x2b8   : > { %2898 = vmatprep.subr.bf16.mxu1 %v2897_v60 }
 0x2b9   : > { %2900 = vmatpush3.bf16.xpose.msra.mxu1 %v2897_v60  ;;  %2930 = vmatprep.subr.bf16.mxu0 %v2929_v58 }
 0x2ba   : > { %2932 = vmatpush3.bf16.xpose.msra.mxu0 %v2929_v58 }
 0x2c0   : > { %2470 = vmatmul.mubr.f32.vlgmr.msra.gmra.mrb[18].mxu1 %v1338_v59 }
 0x2c1   : > { %2472 = vmatprep.mubr.f32.mxu1 %v1339_v16  ;;  %2526 = vmatmul.mubr.f32.vlgmr.msra.gmra.mrb[34].mxu0 %v1677_v44 }
 0x2c2   : > { %2528 = vmatprep.mubr.f32.mxu0 %v1678_v19 }
 0x2c4   : > { %2473 = vmatmul.mubr.f32.gmra.mrb[20].mxu1 %v1340_v52 }
 0x2c5   : > { %2475 = vmatprep.mubr.f32.mxu1 %v1341_v21  ;;  %2529 = vmatmul.mubr.f32.gmra.mrb[36].mxu0 %v1679_v20 }
 0x2c6   : > { %2531 = vmatprep.mubr.f32.mxu0 %v1680_v28 }
 0x2c8   : > { %2476 = vmatmul.mubr.f32.gmra.mrb[22].mxu1 %v1342_v53 }
 0x2c9   : > { %2478 = vmatprep.mubr.f32.mxu1 %v1343_v31  ;;  %2532 = vmatmul.mubr.f32.gmra.mrb[38].mxu0 %v1681_v15 }
 0x2ca   : > { %2534 = vmatprep.mubr.f32.mxu0 %v1682_v32 }
 0x2cc   : > { %2479 = vmatmul.mubr.f32.gmra.mrb[24].mxu1 %v1344_v3 }
 0x2cd   : > { %2535 = vmatmul.mubr.f32.gmra.mrb[40].mxu0 %v1683_v24 }
 0x2d5   : > { %v1290_v42 = vpop.f32.mrb[18].mxu0 }
 0x2d6   : > { %v1292_v41 = vpop.f32.mrb[19].mxu0  ;;  %v1291_v48 = vadd.f32 %v1290_v42, %v987_v5 }
 0x2d7   : > { %v1293_v61 = vadd.f32 %v1292_v41, %v991_v37 }
 0x2d9   : > { %v1296_v40 = vpop.f32.mrb[20].mxu0 }
 0x2da   : > { %v1297_v55 = vadd.f32 %v1296_v40, %v987_v5  ;;  %v1298_v56 = vpop.f32.mrb[21].mxu0 }
 0x2db   : > { %v1299_v63 = vadd.f32 %v1298_v56, %v991_v37 }
 0x2dc   : > { %v2901_v4 = vpack.c.bf16 %v1297_v55, %v1291_v48 }
 0x2dd   : > { %v2933_v6 = vpack.c.bf16 %v1299_v63, %v1293_v61  ;;  %v1302_v60 = vpop.f32.mrb[22].mxu0 }
 0x2de   : > { %v1304_v58 = vpop.f32.mrb[23].mxu0  ;;  %2902 = vmatprep.subr.bf16.mxu1 %v2901_v4  ;;  %v1303_v9 = vadd.f32 %v1302_v60, %v987_v5 }
 0x2df   : > { %2904 = vmatpush3.bf16.msra.mxu1 %v2901_v4  ;;  %2934 = vmatprep.subr.bf16.mxu0 %v2933_v6  ;;  %v1305_v0 = vadd.f32 %v1304_v58, %v991_v37 }
 0x2e0   : > { %2936 = vmatpush3.bf16.msra.mxu0 %v2933_v6 }
 0x2e1   : > { %v1308_v35 = vpop.f32.mrb[24].mxu0 }
 0x2e2   : > { %v1309_v57 = vadd.f32 %v1308_v35, %v987_v5  ;;  %v1310_v10 = vpop.f32.mrb[25].mxu0 }
 0x2e3   : > { %v1311_v2 = vadd.f32 %v1310_v10, %v991_v37 }
 0x2e4   : > { %v2905_v59 = vpack.c.bf16 %v1309_v57, %v1303_v9 }
 0x2e5   : > { %v2937_v12 = vpack.c.bf16 %v1311_v2, %v1305_v0  ;;  %v1314_v44 = vpop.f32.mrb[26].mxu0 }
 0x2e6   : > { %v1316_v16 = vpop.f32.mrb[27].mxu0  ;;  %2906 = vmatprep.subr.bf16.mxu1 %v2905_v59  ;;  %v1315_v14 = vadd.f32 %v1314_v44, %v987_v5 }
 0x2e7   : > { %2908 = vmatpush3.bf16.msra.mxu1 %v2905_v59  ;;  %2938 = vmatprep.subr.bf16.mxu0 %v2937_v12  ;;  %v1317_v52 = vadd.f32 %v1316_v16, %v991_v37 }
 0x2e8   : > { %2940 = vmatpush3.bf16.msra.mxu0 %v2937_v12 }
 0x2e9   : > { %v1320_v46 = vpop.f32.mrb[28].mxu0 }
 0x2ea   : > { %v1321_v19 = vadd.f32 %v1320_v46, %v987_v5  ;;  %v1322_v18 = vpop.f32.mrb[29].mxu0 }
 0x2eb   : > { %v1323_v30 = vadd.f32 %v1322_v18, %v991_v37 }
 0x2ec   : > { %v2909_v20 = vpack.c.bf16 %v1321_v19, %v1315_v14 }
 0x2ed   : > { %v2941_v21 = vpack.c.bf16 %v1323_v30, %v1317_v52  ;;  %v1326_v34 = vpop.f32.mrb[30].mxu0 }
 0x2ee   : > { %v1328_v26 = vpop.f32.mrb[31].mxu0  ;;  %2910 = vmatprep.subr.bf16.mxu1 %v2909_v20  ;;  %v1327_v51 = vadd.f32 %v1326_v34, %v987_v5 }
 0x2ef   : > { %2912 = vmatpush3.bf16.msra.mxu1 %v2909_v20  ;;  %2942 = vmatprep.subr.bf16.mxu0 %v2941_v21  ;;  %v1329_v15 = vadd.f32 %v1328_v26, %v991_v37 }
 0x2f0   : > { %2944 = vmatpush3.bf16.msra.mxu0 %v2941_v21 }
 0x2f1   : > { %v1332_v28 = vpop.f32.mrb[32].mxu0 }
 0x2f2   : > { %v1333_v53 = vadd.f32 %v1332_v28, %v987_v5  ;;  %v1334_v7 = vpop.f32.mrb[33].mxu0 }
 0x2f3   : > { %v1335_v31 = vadd.f32 %v1334_v7, %v991_v37 }
 0x2f4   : > { %v2913_v11 = vpack.c.bf16 %v1333_v53, %v1327_v51 }
 0x2f5   : > { %v2945_v32 = vpack.c.bf16 %v1335_v31, %v1329_v15 }
 0x2f6   : > { %2914 = vmatprep.subr.bf16.mxu1 %v2913_v11 }
 0x2f7   : > { %2916 = vmatpush3.bf16.msra.mxu1 %v2913_v11  ;;  %2946 = vmatprep.subr.bf16.mxu0 %v2945_v32 }
 0x2f8   : > { %2948 = vmatpush3.bf16.msra.mxu0 %v2945_v32 }
 0x393   : > { %v2471_v3 = vpop.f32.mrb[18].mxu1 }
 0x394   : > { %v1419_v24 = vpop.f32.mrb[19].mxu1  ;;  %v2527_v29 = vpop.f32.mrb[34].mxu0  ;;  %v1462_v55 = vsel %vm1458_vm0, %v2471_v3, -inf }
 0x395   : > { %v1758_v23 = vpop.f32.mrb[35].mxu0  ;;  %v1800_v42 = vsel %vm1458_vm0, %v2527_v29, -inf  ;;  %v1459_v56 = vsel %vm1458_vm0, %v1419_v24, -inf }
 0x396   : > { %1801 = vmax.xlane.f32.xlu1 %v1800_v42  ;;  %v1797_v41 = vsel %vm1458_vm0, %v1758_v23, -inf }
 0x397   : > { %1798 = vmax.xlane.f32.xlu0 %v1797_v41  ;;  %v3995_v5 = vpop.f32.mrb[20].mxu1 }
 0x398   : > { %v1429_v37 = vpop.f32.mrb[21].mxu1  ;;  %v3997_v40 = vpop.f32.mrb[36].mxu0  ;;  %v1468_v0 = vsel %vm1458_vm0, %v3995_v5, -inf }
 0x399   : > { %v1768_v48 = vpop.f32.mrb[37].mxu0  ;;  %v1465_v60 = vsel %vm1458_vm0, %v1429_v37, -inf  ;;  %v1806_v2 = vsel %vm1458_vm0, %v3997_v40, -inf }
 0x39a   : > { %1463 = vmax.xlane.f32.xlu1 %v1462_v55  ;;  %v1803_v58 = vsel %vm1458_vm0, %v1768_v48, -inf }
 0x39b   : > { %1460 = vmax.xlane.f32.xlu0 %v1459_v56  ;;  %v4001_v61 = vpop.f32.mrb[22].mxu1 }
 0x39c   : > { %v4003_v63 = vpop.f32.mrb[23].mxu1  ;;  %v4005_v4 = vpop.f32.mrb[38].mxu0  ;;  %v1474_v44 = vsel %vm1458_vm0, %v4001_v61, -inf }
 0x39d   : > { %v4007_v6 = vpop.f32.mrb[39].mxu0  ;;  %v1471_v59 = vsel %vm1458_vm0, %v4003_v63, -inf  ;;  %v1812_v16 = vsel %vm1458_vm0, %v4005_v4, -inf }
 0x39e   : > { %1466 = vmax.xlane.f32.xlu1 %v1465_v60  ;;  %v1809_v12 = vsel %vm1458_vm0, %v4007_v6, -inf }
 0x39f   : > { %1804 = vmax.xlane.f32.xlu0 %v1803_v58  ;;  %v4011_v35 = vpop.f32.mrb[24].mxu1 }
 0x3a0   : > { %v4013_v9 = vpop.f32.mrb[25].mxu1  ;;  %v4015_v57 = vpop.f32.mrb[40].mxu0  ;;  %v1480_v19 = vsel %vm1458_vm0, %v4011_v35, -inf }
 0x3a1   : > { %v4017_v10 = vpop.f32.mrb[41].mxu0  ;;  %v1477_v46 = vsel %vm1458_vm0, %v4013_v9, -inf  ;;  %v1818_v18 = vsel %vm1458_vm0, %v4015_v57, -inf }
 0x3a2   : > { %1469 = vmax.xlane.f32.xlu1 %v1468_v0  ;;  %v1815_v14 = vsel %vm1458_vm0, %v4017_v10, -inf }
 0x3a3   : > { %1807 = vmax.xlane.f32.xlu0 %v1806_v2 }
 0x3a6   : > { %1472 = vmax.xlane.f32.xlu1 %v1471_v59 }
 0x3a7   : > { %1810 = vmax.xlane.f32.xlu0 %v1809_v12 }
 0x3aa   : > { %1475 = vmax.xlane.f32.xlu1 %v1474_v44 }
 0x3ab   : > { %1813 = vmax.xlane.f32.xlu0 %v1812_v16 }
 0x3ae   : > { %1478 = vmax.xlane.f32.xlu1 %v1477_v46 }
 0x3af   : > { %1816 = vmax.xlane.f32.xlu0 %v1815_v14 }
 0x3b2   : > { %1481 = vmax.xlane.f32.xlu1 %v1480_v19 }
 0x3b3   : > { %1819 = vmax.xlane.f32.xlu0 %v1818_v18 }
 0x423   : > { %v1802_v52 = vpop.xlane.xlu1 %1801 }
 0x424   : > { %v1822_v30 = vsub.f32 %v2527_v29, %v1802_v52  ;;  %v1799_v20 = vpop.xlane.xlu0 %1798 }
 0x425   : > { %v1821_v21 = vsub.f32 %v1758_v23, %v1799_v20 }
 0x426   : > { %v1831_v34 = vmul.f32 1.442695, %v1822_v30 }
 0x427   : > { %v1829_v26 = vmul.f32 1.442695, %v1821_v21  ;;  %v1464_v28 = vpop.xlane.xlu1 %1463 }
 0x428   : > { %v1484_v51 = vsub.f32 %v2471_v3, %v1464_v28  ;;  %v1461_v53 = vpop.xlane.xlu0 %1460 }
 0x429   : > { %3100 = vpow2.f32 %v1829_v26  ;;  %v1483_v7 = vsub.f32 %v1419_v24, %v1461_v53 }
 0x42a   : > { %3102 = vpow2.f32 %v1831_v34  ;;  %v1493_v15 = vmul.f32 1.442695, %v1484_v51 }
 0x42b   : > { %v1491_v31 = vmul.f32 1.442695, %v1483_v7  ;;  %v1467_v11 = vpop.xlane.xlu1 %1466 }
 0x42c   : > { %v1485_v32 = vsub.f32 %v1429_v37, %v1467_v11  ;;  %v1805_v42 = vpop.xlane.xlu0 %1804 }
 0x42d   : > { %3104 = vpow2.f32 %v1491_v31  ;;  %v1823_v41 = vsub.f32 %v1768_v48, %v1805_v42 }
 0x42e   : > { %3106 = vpow2.f32 %v1493_v15  ;;  %v1495_v55 = vmul.f32 1.442695, %v1485_v32 }
 0x42f   : > { %v1833_v29 = vmul.f32 1.442695, %v1823_v41  ;;  %v1470_v56 = vpop.xlane.xlu1 %1469 }
 0x430   : > { %v1486_v23 = vsub.f32 %v3995_v5, %v1470_v56  ;;  %v1808_v60 = vpop.xlane.xlu0 %1807 }
 0x431   : > { %3108 = vpow2.f32 %v1833_v29  ;;  %v1824_v3 = vsub.f32 %v3997_v40, %v1808_v60 }
 0x432   : > { %3110 = vpow2.f32 %v1495_v55  ;;  %v1497_v24 = vmul.f32 1.442695, %v1486_v23 }
 0x433   : > { %v4041_v58 = vpop.eup %3100  ;;  %v1835_v0 = vmul.f32 1.442695, %v1824_v3  ;;  %v1473_v2 = vpop.xlane.xlu1 %1472 }
 0x434   : > { %v1487_v37 = vsub.f32 %v4003_v63, %v1473_v2  ;;  %v1811_v59 = vpop.xlane.xlu0 %1810  ;;  %v1845_v48 = vsel %vm1458_vm0, %v4041_v58, 0.0  ;;  %v4046_v12 = vpop.eup %3102 }
 0x435   : > { %3112 = vpow2.f32 %v1835_v0  ;;  %v1825_v5 = vsub.f32 %v4007_v6, %v1811_v59  ;;  %1846 = vadd.xlane.f32.xlu0 %v1845_v48  ;;  %v1848_v63 = vsel %vm1458_vm0, %v4046_v12, 0.0 }
 0x436   : > { %3114 = vpow2.f32 %v1497_v24  ;;  %v1499_v40 = vmul.f32 1.442695, %v1487_v37 }
 0x437   : > { %v4049_v44 = vpop.eup %3104  ;;  %v1837_v16 = vmul.f32 1.442695, %v1825_v5  ;;  %v1476_v46 = vpop.xlane.xlu1 %1475 }
 0x438   : > { %v1488_v14 = vsub.f32 %v4001_v61, %v1476_v46  ;;  %v1814_v19 = vpop.xlane.xlu0 %1813  ;;  %v1507_v18 = vsel %vm1458_vm0, %v4049_v44, 0.0  ;;  %v4056_v52 = vpop.eup %3106 }
 0x439   : > { %3116 = vpow2.f32 %v1837_v16  ;;  %v1826_v6 = vsub.f32 %v4005_v4, %v1814_v19  ;;  %1849 = vadd.xlane.f32.xlu0 %v1848_v63  ;;  %1508 = vadd.xlane.f32.xlu1 %v1507_v18  ;;  %v1510_v51 = vsel %vm1458_vm0, %v4056_v52, 0.0  ;;  %v2015_v63 = vld [vmem:[#allocation8 + $0x8] sm:$0xff]  ;;  %v2017_v18 = vld [vmem:[#allocation8 + $0x18] sm:$0xff] }
 0x43a   : > { %3118 = vpow2.f32 %v1499_v40  ;;  %v1501_v20 = vmul.f32 1.442695, %v1488_v14 }
 0x43b   : > { %v4059_v30 = vpop.eup %3108  ;;  %v1839_v21 = vmul.f32 1.442695, %v1826_v6  ;;  %v1479_v61 = vpop.xlane.xlu1 %1478  ;;  %v2949_v6 = vpack.c.bf16 %v2017_v18, %v2015_v63  ;;  %v2025_v63 = vld [vmem:[#allocation8 + $0x58] sm:$0xff] }
 0x43c   : > { %v1489_v34 = vsub.f32 %v4013_v9, %v1479_v61  ;;  %v1817_v26 = vpop.xlane.xlu0 %1816  ;;  %v1851_v28 = vsel %vm1458_vm0, %v4059_v30, 0.0  ;;  %v4066_v53 = vpop.eup %3110 }
 0x43d   : > { %3120 = vpow2.f32 %v1839_v21  ;;  %v1827_v4 = vsub.f32 %v4017_v10, %v1817_v26  ;;  %1852 = vadd.xlane.f32.xlu0 %v1851_v28  ;;  %1511 = vadd.xlane.f32.xlu1 %v1510_v51  ;;  %v1513_v41 = vsel %vm1458_vm0, %v4066_v53, 0.0 }
 0x43e   : > { %3122 = vpow2.f32 %v1501_v20  ;;  %v1503_v15 = vmul.f32 1.442695, %v1489_v34  ;;  %2950 = vmatprep.subr.bf16.mxu1 %v2949_v6 }
 0x43f   : > { %v4069_v7 = vpop.eup %3112  ;;  %v1841_v31 = vmul.f32 1.442695, %v1827_v4  ;;  %v1482_v9 = vpop.xlane.xlu1 %1481 }
 0x440   : > { %v1490_v11 = vsub.f32 %v4011_v35, %v1482_v9  ;;  %v1820_v32 = vpop.xlane.xlu0 %1819  ;;  %v1854_v42 = vsel %vm1458_vm0, %v4069_v7, 0.0  ;;  %v4076_v55 = vpop.eup %3114 }
 0x441   : > { %3124 = vpow2.f32 %v1841_v31  ;;  %v1828_v10 = vsub.f32 %v4015_v57, %v1820_v32  ;;  %1855 = vadd.xlane.f32.xlu0 %v1854_v42  ;;  %1514 = vadd.xlane.f32.xlu1 %v1513_v41  ;;  %v1516_v60 = vsel %vm1458_vm0, %v4076_v55, 0.0 }
 0x442   : > { %3126 = vpow2.f32 %v1503_v15  ;;  %v1505_v56 = vmul.f32 1.442695, %v1490_v11 }
 0x443   : > { %v4079_v29 = vpop.eup %3116  ;;  %v1843_v23 = vmul.f32 1.442695, %v1828_v10  ;;  %v2014_v10 = vld [vmem:[#allocation8] sm:$0xff] }
 0x444   : > { %v1857_v35 = vsel %vm1458_vm0, %v4079_v29, 0.0  ;;  %v4085_v3 = vpop.eup %3118 }
 0x445   : > { %3128 = vpow2.f32 %v1843_v23  ;;  %1858 = vadd.xlane.f32.xlu0 %v1857_v35  ;;  %1517 = vadd.xlane.f32.xlu1 %v1516_v60  ;;  %v1519_v0 = vsel %vm1458_vm0, %v4085_v3, 0.0  ;;  %v2019_v23 = vld [vmem:[#allocation8 + $0x28] sm:$0xff] }
 0x446   : > { %3130 = vpow2.f32 %v1505_v56  ;;  %v2016_v56 = vld [vmem:[#allocation8 + $0x10] sm:$0xff] }
 0x447   : > { %v4087_v24 = vpop.eup %3120 }
 0x448   : > { %v1860_v57 = vsel %vm1458_vm0, %v4087_v24, 0.0  ;;  %v4093_v2 = vpop.eup %3122 }
 0x449   : > { %1861 = vadd.xlane.f32.xlu0 %v1860_v57  ;;  %1520 = vadd.xlane.f32.xlu1 %v1519_v0  ;;  %v1522_v48 = vsel %vm1458_vm0, %v4093_v2, 0.0 }
 0x44b   : > { %v4095_v37 = vpop.eup %3124 }
 0x44c   : > { %v1863_v59 = vsel %vm1458_vm0, %v4095_v37, 0.0  ;;  %v4101_v5 = vpop.eup %3126 }
 0x44d   : > { %1864 = vadd.xlane.f32.xlu0 %v1863_v59  ;;  %1523 = vadd.xlane.f32.xlu1 %v1522_v48  ;;  %v1525_v46 = vsel %vm1458_vm0, %v4101_v5, 0.0  ;;  %v2951_v59 = vpack.c.bf16 %v2016_v56, %v2014_v10  ;;  %v2028_v10 = vld [vmem:[#allocation8 + $0x70] sm:$0xff]  ;;  %v2031_v56 = vld [vmem:[#allocation8 + $0x88] sm:$0xff] }
 0x44f   : > { %v4103_v40 = vpop.eup %3128 }
 0x450   : > { %v1866_v16 = vsel %vm1458_vm0, %v4103_v40, 0.0  ;;  %v4109_v14 = vpop.eup %3130 }
 0x451   : > { %1867 = vadd.xlane.f32.xlu0 %v1866_v16  ;;  %1526 = vadd.xlane.f32.xlu1 %v1525_v46  ;;  %v1528_v19 = vsel %vm1458_vm0, %v4109_v14, 0.0  ;;  %v2018_v16 = vld [vmem:[#allocation8 + $0x20] sm:$0xff]  ;;  %v2020_v46 = vld [vmem:[#allocation8 + $0x30] sm:$0xff] }
 0x455   : > { %1529 = vadd.xlane.f32.xlu1 %v1528_v19  ;;  %v2023_v19 = vld [vmem:[#allocation8 + $0x48] sm:$0xff] }
 0x4c2   : > { %v1847_v20 = vpop.xlane.xlu0 %1846 }
 0x4c3   : > { %3132 = vrcp.f32 %v1847_v20 }
 0x4c6   : > { %v1850_v21 = vpop.xlane.xlu0 %1849  ;;  %v1509_v61 = vpop.xlane.xlu1 %1508 }
 0x4c7   : > { %3134 = vrcp.f32 %v1850_v21 }
 0x4c8   : > { %3136 = vrcp.f32 %v1509_v61  ;;  %v2955_v61 = vpack.c.bf16 %v2020_v46, %v2018_v16 }
 0x4ca   : > { %v1853_v34 = vpop.xlane.xlu0 %1852  ;;  %v1512_v26 = vpop.xlane.xlu1 %1511 }
 0x4cb   : > { %3138 = vrcp.f32 %v1853_v34  ;;  %v2957_v34 = vpack.c.bf16 %v2025_v63, %v2023_v19 }
 0x4cc   : > { %3140 = vrcp.f32 %v1512_v26  ;;  %v2022_v26 = vld [vmem:[#allocation8 + $0x40] sm:$0xff] }
 0x4cd   : > { %v3133_v28 = vpop.eup %3132 }
 0x4ce   : > { %v1856_v51 = vpop.xlane.xlu0 %1855  ;;  %v1515_v4 = vpop.xlane.xlu1 %1514  ;;  %v1870_v15 = vmul.f32 %v3133_v28, %v4041_v58  ;;  %v2021_v58 = vld [vmem:[#allocation8 + $0x38] sm:$0xff]  ;;  %v2024_v28 = vld [vmem:[#allocation8 + $0x50] sm:$0xff] }
 0x4cf   : > { %3142 = vrcp.f32 %v1856_v51  ;;  %v2027_v51 = vld [vmem:[#allocation8 + $0x68] sm:$0xff] }
 0x4d0   : > { %3144 = vrcp.f32 %v1515_v4  ;;  %2553 = vmatprep.mubr.msk.f32.mxu0 %vm1458_vm0, %v1870_v15  ;;  %v2029_v4 = vld [vmem:[#allocation8 + $0x78] sm:$0xff] }
 0x4d1   : > { %v3135_v31 = vpop.eup %3134 }
 0x4d2   : > { %v3137_v9 = vpop.eup %3136  ;;  %v1872_v11 = vmul.f32 %v3135_v31, %v4046_v12  ;;  %v1859_v32 = vpop.xlane.xlu0 %1858 }
 0x4d3   : > { %v1518_v42 = vpop.xlane.xlu1 %1517  ;;  %3146 = vrcp.f32 %v1859_v32  ;;  %v1532_v41 = vmul.f32 %v3137_v9, %v4049_v44  ;;  %v2953_v44 = vpack.c.bf16 %v2021_v58, %v2019_v23  ;;  %v2959_v32 = vpack.c.bf16 %v2024_v28, %v2022_v26  ;;  %v2033_v23 = vld [vmem:[#allocation8 + $0x98] sm:$0xff]  ;;  %v2038_v26 = vld [vmem:[#allocation8 + $0xc0] sm:$0xff]  ;;  %v2040_v28 = vld [vmem:[#allocation8 + $0xd0] sm:$0xff] }
 0x4d4   : > { %3148 = vrcp.f32 %v1518_v42  ;;  %2554 = vmatmul.mubr.msk.f32.vlgmr.msra.gmra.mrb[42].mxu0 %vm1458_vm0, %v1872_v11  ;;  %v2961_v42 = vpack.c.bf16 %v2029_v4, %v2027_v51  ;;  %v2043_v51 = vld [vmem:[#allocation8 + $0xe8] sm:$0xff]  ;;  %v2045_v4 = vld [vmem:[#allocation8 + $0xf8] sm:$0xff] }
 0x4d5   : > { %v3139_v35 = vpop.eup %3138  ;;  %2497 = vmatprep.mubr.msk.f32.mxu1 %vm1458_vm0, %v1532_v41  ;;  %v2026_v41 = vld [vmem:[#allocation8 + $0x60] sm:$0xff] }
 0x4d6   : > { %v3141_v60 = vpop.eup %3140  ;;  %v1862_v57 = vpop.xlane.xlu0 %1861  ;;  %v1874_v12 = vmul.f32 %v3139_v35, %v4059_v30 }
 0x4d7   : > { %v1521_v0 = vpop.xlane.xlu1 %1520  ;;  %v1534_v48 = vmul.f32 %v3141_v60, %v4056_v52  ;;  %3150 = vrcp.f32 %v1862_v57  ;;  %v2963_v57 = vpack.c.bf16 %v2028_v10, %v2026_v41  ;;  %v2046_v41 = vld [vmem:[#allocation8 + $0x100] sm:$0xff]  ;;  %v2048_v10 = vld [vmem:[#allocation8 + $0x110] sm:$0xff] }
 0x4d8   : > { %3152 = vrcp.f32 %v1521_v0  ;;  %2556 = vmatprep.mubr.msk.f32.mxu0 %vm1458_vm0, %v1874_v12  ;;  %v2965_v0 = vpack.c.bf16 %v2033_v23, %v2031_v56  ;;  %v2030_v12 = vld [vmem:[#allocation8 + $0x80] sm:$0xff]  ;;  %v2051_v56 = vld [vmem:[#allocation8 + $0x128] sm:$0xff]  ;;  %v2053_v23 = vld [vmem:[#allocation8 + $0x138] sm:$0xff] }
 0x4d9   : > { %v3143_v18 = vpop.eup %3142  ;;  %2498 = vmatmul.mubr.msk.f32.vlgmr.msra.gmra.mrb[26].mxu1 %vm1458_vm0, %v1534_v48  ;;  %v2035_v48 = vld [vmem:[#allocation8 + $0xa8] sm:$0xff] }
 0x4da   : > { %v3145_v6 = vpop.eup %3144  ;;  %v1865_v20 = vpop.xlane.xlu0 %1864  ;;  %v1876_v30 = vmul.f32 %v3143_v18, %v4069_v7  ;;  %2952 = vmatpush1.bf16.msra.mxu1 %v2951_v59  ;;  %v2032_v59 = vld [vmem:[#allocation8 + $0x90] sm:$0xff]  ;;  %v2034_v18 = vld [vmem:[#allocation8 + $0xa0] sm:$0xff] }
 0x4db   : > { %v1524_v21 = vpop.xlane.xlu1 %1523  ;;  %3154 = vrcp.f32 %v1865_v20  ;;  %v1536_v52 = vmul.f32 %v3145_v6, %v4066_v53  ;;  %2954 = vmatprep.subr.bf16.mxu1 %v2953_v44  ;;  %v2037_v44 = vld [vmem:[#allocation8 + $0xb8] sm:$0xff]  ;;  %v2036_v6 = vld [vmem:[#allocation8 + $0xb0] sm:$0xff]  ;;  %v2039_v20 = vld [vmem:[#allocation8 + $0xc8] sm:$0xff] }
 0x4dc   : > { %3156 = vrcp.f32 %v1524_v21  ;;  %2557 = vmatmul.mubr.msk.f32.gmra.mrb[44].mxu0 %vm1458_vm0, %v1876_v30  ;;  %v2041_v21 = vld [vmem:[#allocation8 + $0xd8] sm:$0xff] }
 0x4dd   : > { %v3147_v15 = vpop.eup %3146  ;;  %2500 = vmatprep.mubr.msk.f32.mxu1 %vm1458_vm0, %v1536_v52 }
 0x4de   : > { %v3149_v31 = vpop.eup %3148  ;;  %v1868_v9 = vpop.xlane.xlu0 %1867  ;;  %v1878_v11 = vmul.f32 %v3147_v15, %v4079_v29  ;;  %2956 = vmatpush1.bf16.msra.mxu1 %v2955_v61 }
 0x4df   : > { %v1527_v7 = vpop.xlane.xlu1 %1526  ;;  %3158 = vrcp.f32 %v1868_v9  ;;  %v1538_v53 = vmul.f32 %v3149_v31, %v4076_v55  ;;  %2958 = vmatprep.subr.bf16.mxu1 %v2957_v34  ;;  %v2975_v9 = vpack.c.bf16 %v2040_v28, %v2038_v26  ;;  %v2071_v26 = vld [vmem:[#allocation8 + $0x1c8] sm:$0xff]  ;;  %v2073_v28 = vld [vmem:[#allocation8 + $0x1d8] sm:$0xff] }
 0x4e0   : > { %3160 = vrcp.f32 %v1527_v7  ;;  %2559 = vmatprep.mubr.msk.f32.mxu0 %vm1458_vm0, %v1878_v11  ;;  %v2042_v7 = vld [vmem:[#allocation8 + $0xe0] sm:$0xff]  ;;  %v2044_v11 = vld [vmem:[#allocation8 + $0xf0] sm:$0xff] }
 0x4e1   : > { %v3151_v58 = vpop.eup %3150  ;;  %2501 = vmatmul.mubr.msk.f32.gmra.mrb[28].mxu1 %vm1458_vm0, %v1538_v53  ;;  %v2979_v53 = vpack.c.bf16 %v2044_v11, %v2042_v7  ;;  %v2077_v7 = vld [vmem:[#allocation8 + $0x1f8] sm:$0xff] }
 0x4e2   : > { %v3153_v35 = vpop.eup %3152  ;;  %v1880_v29 = vmul.f32 %v3151_v58, %v4087_v24  ;;  %2960 = vmatpush1.bf16.msra.mxu1 %v2959_v32  ;;  %v2967_v24 = vpack.c.bf16 %v2032_v59, %v2030_v12  ;;  %v2049_v32 = vld [vmem:[#allocation8 + $0x118] sm:$0xff]  ;;  %v2985_v58 = vpack.c.bf16 %v2053_v23, %v2051_v56  ;;  %v2054_v12 = vld [vmem:[#allocation8 + $0x140] sm:$0xff]  ;;  %v2056_v59 = vld [vmem:[#allocation8 + $0x150] sm:$0xff] }
 0x4e3   : > { %v1530_v60 = vpop.xlane.xlu1 %1529  ;;  %v1540_v55 = vmul.f32 %v3153_v35, %v4085_v3  ;;  %2962 = vmatprep.subr.bf16.mxu1 %v2961_v42  ;;  %v2969_v3 = vpack.c.bf16 %v2037_v44, %v2035_v48  ;;  %v2050_v35 = vld [vmem:[#allocation8 + $0x120] sm:$0xff]  ;;  %v2059_v48 = vld [vmem:[#allocation8 + $0x168] sm:$0xff]  ;;  %v2061_v44 = vld [vmem:[#allocation8 + $0x178] sm:$0xff] }
 0x4e4   : > { %3162 = vrcp.f32 %v1530_v60  ;;  %2560 = vmatmul.mubr.msk.f32.gmra.mrb[46].mxu0 %vm1458_vm0, %v1880_v29  ;;  %v2052_v60 = vld [vmem:[#allocation8 + $0x130] sm:$0xff]  ;;  %v2055_v29 = vld [vmem:[#allocation8 + $0x148] sm:$0xff] }
 0x4e5   : > { %v3155_v16 = vpop.eup %3154  ;;  %2503 = vmatprep.mubr.msk.f32.mxu1 %vm1458_vm0, %v1540_v55  ;;  %v2987_v55 = vpack.c.bf16 %v2052_v60, %v2050_v35 }
 0x4e6   : > { %v3157_v46 = vpop.eup %3156  ;;  %v1882_v19 = vmul.f32 %v3155_v16, %v4095_v37  ;;  %2964 = vmatpush1.bf16.msra.mxu1 %v2963_v57  ;;  %v2971_v37 = vpack.c.bf16 %v2036_v6, %v2034_v18  ;;  %v2057_v57 = vld [vmem:[#allocation8 + $0x158] sm:$0xff]  ;;  %v2991_v16 = vpack.c.bf16 %v2056_v59, %v2054_v12 }
 0x4e7   : > { %v1542_v63 = vmul.f32 %v3157_v46, %v4093_v2  ;;  %2966 = vmatprep.subr.bf16.mxu1 %v2965_v0  ;;  %v2973_v2 = vpack.c.bf16 %v2041_v21, %v2039_v20  ;;  %v2989_v0 = vpack.c.bf16 %v2057_v57, %v2055_v29  ;;  %v2993_v46 = vpack.c.bf16 %v2061_v44, %v2059_v48  ;;  %v2062_v20 = vld [vmem:[#allocation8 + $0x180] sm:$0xff]  ;;  %v2064_v21 = vld [vmem:[#allocation8 + $0x190] sm:$0xff] }
 0x4e8   : > { %2562 = vmatprep.mubr.msk.f32.mxu0 %vm1458_vm0, %v1882_v19  ;;  %v2058_v19 = vld [vmem:[#allocation8 + $0x160] sm:$0xff] }
 0x4e9   : > { %v3159_v30 = vpop.eup %3158  ;;  %2504 = vmatmul.mubr.msk.f32.gmra.mrb[30].mxu1 %vm1458_vm0, %v1542_v63  ;;  %v2063_v63 = vld [vmem:[#allocation8 + $0x188] sm:$0xff]  ;;  %v2078_v44 = vld [vmem:[%s4254_s7] sm:$0x3] }
 0x4ea   : > { %v3161_v61 = vpop.eup %3160  ;;  %v1884_v52 = vmul.f32 %v3159_v30, %v4103_v40  ;;  %2968 = vmatpush1.bf16.msra.mxu1 %v2967_v24  ;;  %v2977_v40 = vpack.c.bf16 %v2045_v4, %v2043_v51  ;;  %v2060_v24 = vld [vmem:[#allocation8 + $0x170] sm:$0xff]  ;;  %v2067_v30 = vld [vmem:[#allocation8 + $0x1a8] sm:$0xff]  ;;  %v3005_v4 = vpack.c.bf16 %v2073_v28, %v2071_v26 }
 0x4eb   : > { %v1544_v34 = vmul.f32 %v3161_v61, %v4101_v5  ;;  %2970 = vmatprep.subr.bf16.mxu1 %v2969_v3  ;;  %v2047_v5 = vld [vmem:[#allocation8 + $0x108] sm:$0xff]  ;;  %v2065_v3 = vld [vmem:[#allocation8 + $0x198] sm:$0xff]  ;;  %v2995_v18 = vpack.c.bf16 %v2060_v24, %v2058_v19 }
 0x4ec   : > { %2563 = vmatmul.mubr.msk.f32.gmra.mrb[48].mxu0 %vm1458_vm0, %v1884_v52  ;;  %v2981_v42 = vpack.c.bf16 %v2049_v32, %v2047_v5  ;;  %v2997_v6 = vpack.c.bf16 %v2065_v3, %v2063_v63  ;;  %v2069_v61 = vld [vmem:[#allocation8 + $0x1b8] sm:$0xff]  ;;  %v2999_v52 = vpack.c.bf16 %v2064_v21, %v2062_v20  ;;  %v2074_v5 = vld [vmem:[#allocation8 + $0x1e0] sm:$0xff]  ;;  %v2076_v32 = vld [vmem:[#allocation8 + $0x1f0] sm:$0xff] }
 0x4ed   : > { %2506 = vmatprep.mubr.msk.f32.mxu1 %vm1458_vm0, %v1544_v34  ;;  %v2066_v34 = vld [vmem:[#allocation8 + $0x1a0] sm:$0xff] }
 0x4ee   : > { %v3163_v15 = vpop.eup %3162  ;;  %2972 = vmatpush1.bf16.msra.mxu1 %v2971_v37  ;;  %v3001_v37 = vpack.c.bf16 %v2069_v61, %v2067_v30 }
 0x4ef   : > { %v1546_v31 = vmul.f32 %v3163_v15, %v4109_v14  ;;  %2974 = vmatprep.subr.bf16.mxu1 %v2973_v2  ;;  %v2983_v14 = vpack.c.bf16 %v2048_v10, %v2046_v41  ;;  %v2068_v2 = vld [vmem:[#allocation8 + $0x1b0] sm:$0xff]  ;;  %v2070_v15 = vld [vmem:[#allocation8 + $0x1c0] sm:$0xff] }
 0x4f0   : > { %v3003_v51 = vpack.c.bf16 %v2068_v2, %v2066_v34 }
 0x4f1   : > { %2507 = vmatmul.mubr.msk.f32.gmra.mrb[32].mxu1 %vm1458_vm0, %v1546_v31  ;;  %v2072_v31 = vld [vmem:[#allocation8 + $0x1d0] sm:$0xff] }
 0x4f2   : > { %2976 = vmatpush1.bf16.msra.mxu1 %v2975_v9  ;;  %v3007_v9 = vpack.c.bf16 %v2072_v31, %v2070_v15 }
 0x4f3   : > { %2978 = vmatprep.subr.bf16.mxu1 %v2977_v40  ;;  %v2075_v40 = vld [vmem:[#allocation8 + $0x1e8] sm:$0xff] }
 0x4f4   : > { %v3009_v11 = vpack.c.bf16 %v2077_v7, %v2075_v40 }
 0x4f6   : > { %2980 = vmatpush1.bf16.msra.mxu1 %v2979_v53  ;;  %v3011_v53 = vpack.c.bf16 %v2076_v32, %v2074_v5 }
 0x4f7   : > { %2982 = vmatprep.subr.bf16.mxu1 %v2981_v42 }
 0x4fa   : > { %2984 = vmatpush1.bf16.msra.mxu1 %v2983_v14 }
 0x4fb   : > { %2986 = vmatprep.subr.bf16.mxu1 %v2985_v58 }
 0x4fe   : > { %2988 = vmatpush1.bf16.msra.mxu1 %v2987_v55 }
 0x4ff   : > { %2990 = vmatprep.subr.bf16.mxu1 %v2989_v0 }
 0x502   : > { %2992 = vmatpush1.bf16.msra.mxu1 %v2991_v16  ;;  %v2083_v16 = vrot.slane %v2078_v44, %v3728_v38 }
 0x503   : > { %2994 = vmatprep.subr.bf16.mxu1 %v2993_v46  ;;  %v4150_v46 = vrot.slane %v2078_v44, %v3731_v39 }
 0x506   : > { %2996 = vmatpush1.bf16.msra.mxu1 %v2995_v18 }
 0x507   : > { %2998 = vmatprep.subr.bf16.mxu1 %v2997_v6 }
 0x50a   : > { %3000 = vmatpush1.bf16.msra.mxu1 %v2999_v52 }
 0x50b   : > { %3002 = vmatprep.subr.bf16.mxu1 %v3001_v37 }
 0x50e   : > { %3004 = vmatpush1.bf16.msra.mxu1 %v3003_v51 }
 0x50f   : > { %3006 = vmatprep.subr.bf16.mxu1 %v3005_v4 }
 0x512   : > { %3008 = vmatpush1.bf16.msra.mxu1 %v3007_v9 }
 0x513   : > { %3010 = vmatprep.subr.bf16.mxu1 %v3009_v11 }
 0x516   : > { %3012 = vmatpush1.bf16.msra.mxu1 %v3011_v53 }
 0x5a7   : > { %v2555_v42 = vpop.f32.mrb[42].mxu0 }
 0x5a8   : > { %v1975_v41 = vpop.f32.mrb[43].mxu0 }
 0x5a9   : > { %2154 = vmatprep.mubr.f32.mxu1 %v1975_v41 }
 0x5ac   : > { %v2499_v10 = vpop.f32.mrb[26].mxu1 }
 0x5ad   : > { %v1637_v56 = vpop.f32.mrb[27].mxu1 }
 0x5ae   : > { %2155 = vmatmul.mubr.f32.vlgmr.msra.gmra.mrb[34].mxu1 %v1637_v56 }
 0x5af   : > { %2160 = vmatprep.mubr.f32.mxu1 %v2555_v42  ;;  %v2558_v23 = vpop.f32.mrb[44].mxu0 }
 0x5b0   : > { %v1985_v14 = vpop.f32.mrb[45].mxu0 }
 0x5b2   : > { %2161 = vmatmul.mubr.f32.gmra.mrb[36].mxu1 %v2499_v10 }
 0x5b3   : > { %2166 = vmatprep.mubr.f32.mxu1 %v1985_v14 }
 0x5b4   : > { %v2502_v58 = vpop.f32.mrb[28].mxu1 }
 0x5b5   : > { %v1647_v35 = vpop.f32.mrb[29].mxu1 }
 0x5b6   : > { %2167 = vmatmul.mubr.f32.gmra.mrb[38].mxu1 %v1647_v35 }
 0x5b7   : > { %2172 = vmatprep.mubr.f32.mxu1 %v2558_v23  ;;  %v2561_v60 = vpop.f32.mrb[46].mxu0 }
 0x5b8   : > { %v1995_v29 = vpop.f32.mrb[47].mxu0 }
 0x5ba   : > { %2173 = vmatmul.mubr.f32.gmra.mrb[40].mxu1 %v2502_v58 }
 0x5bb   : > { %2178 = vmatprep.mubr.f32.mxu1 %v1995_v29 }
 0x5bc   : > { %v2505_v57 = vpop.f32.mrb[30].mxu1 }
 0x5bd   : > { %v1657_v55 = vpop.f32.mrb[31].mxu1 }
 0x5be   : > { %2179 = vmatmul.mubr.f32.gmra.mrb[42].mxu1 %v1657_v55 }
 0x5bf   : > { %2184 = vmatprep.mubr.f32.mxu1 %v2561_v60  ;;  %v2564_v0 = vpop.f32.mrb[48].mxu0 }
 0x5c0   : > { %v2005_v12 = vpop.f32.mrb[49].mxu0 }
 0x5c2   : > { %2185 = vmatmul.mubr.f32.gmra.mrb[44].mxu1 %v2505_v57 }
 0x5c3   : > { %2190 = vmatprep.mubr.f32.mxu1 %v2005_v12 }
 0x5c4   : > { %v2508_v59 = vpop.f32.mrb[32].mxu1 }
 0x5c5   : > { %v1667_v48 = vpop.f32.mrb[33].mxu1 }
 0x5c6   : > { %2191 = vmatmul.mubr.f32.gmra.mrb[46].mxu1 %v1667_v48 }
 0x5c7   : > { %2196 = vmatprep.mubr.f32.mxu1 %v2564_v0 }
 0x5ca   : > { %2197 = vmatmul.mubr.f32.gmra.mrb[48].mxu1 %v2508_v59 }
 0x681   : > { %v2156_v19 = vpop.f32.mrb[34].mxu1 }
 0x682   : > { %v2157_v24 = vadd.f32 %v2156_v19, %v2083_v16  ;;  %v2158_v63 = vpop.f32.mrb[35].mxu1 }
 0x683   : > { %v2159_v3 = vadd.f32 %v2158_v63, %v4150_v46 }
 0x684   : > { %v2203_v18 = vadd.f32 %v2157_v24, %v3793_v27 }
 0x685   : > { %v2204_v6 = vadd.f32 %v2159_v3, %v3790_v17  ;;  %v2162_v20 = vpop.f32.mrb[36].mxu1 }
 0x686   : > { %2219 = vst [vmem:[%s4157_s20] sm:$0xff] %v2203_v18  ;;  %v2163_v38 = vadd.f32 %v2162_v20, %v2083_v16  ;;  %v2164_v39 = vpop.f32.mrb[37].mxu1 }
 0x687   : > { %2220 = vst [vmem:[%s4157_s20 + $0x8] sm:$0xff] %v2204_v6  ;;  %v2165_v21 = vadd.f32 %v2164_v39, %v4150_v46 }
 0x688   : > { %v2205_v27 = vadd.f32 %v2163_v38, %v3817_v47 }
 0x689   : > { %v2206_v17 = vadd.f32 %v2165_v21, %v3796_v1  ;;  %v2168_v30 = vpop.f32.mrb[38].mxu1 }
 0x68a   : > { %2221 = vst [vmem:[%s4157_s20 + $0x10] sm:$0xff] %v2205_v27  ;;  %v2169_v61 = vadd.f32 %v2168_v30, %v2083_v16  ;;  %v2170_v52 = vpop.f32.mrb[39].mxu1 }
 0x68b   : > { %2222 = vst [vmem:[%s4157_s20 + $0x18] sm:$0xff] %v2206_v17  ;;  %v2171_v37 = vadd.f32 %v2170_v52, %v4150_v46 }
 0x68c   : > { %v2207_v34 = vadd.f32 %v2169_v61, %v3834_v50 }
 0x68d   : > { %v2208_v2 = vadd.f32 %v2171_v37, %v3823_v62  ;;  %v2174_v26 = vpop.f32.mrb[40].mxu1 }
 0x68e   : > { %2223 = vst [vmem:[%s4157_s20 + $0x20] sm:$0xff] %v2207_v34  ;;  %v2175_v28 = vadd.f32 %v2174_v26, %v2083_v16  ;;  %v2176_v47 = vpop.f32.mrb[41].mxu1 }
 0x68f   : > { %2224 = vst [vmem:[%s4157_s20 + $0x28] sm:$0xff] %v2208_v2  ;;  %v2177_v1 = vadd.f32 %v2176_v47, %v4150_v46 }
 0x690   : > { %v2209_v51 = vadd.f32 %v2175_v28, %v3846_v43 }
 0x691   : > { %v2210_v4 = vadd.f32 %v2177_v1, %v3838_v8  ;;  %v2180_v15 = vpop.f32.mrb[42].mxu1 }
 0x692   : > { %2225 = vst [vmem:[%s4157_s20 + $0x30] sm:$0xff] %v2209_v51  ;;  %v2181_v31 = vadd.f32 %v2180_v15, %v2083_v16  ;;  %v2182_v50 = vpop.f32.mrb[43].mxu1 }
 0x693   : > { %2226 = vst [vmem:[%s4157_s20 + $0x38] sm:$0xff] %v2210_v4  ;;  %v2183_v62 = vadd.f32 %v2182_v50, %v4150_v46 }
 0x694   : > { %v2211_v9 = vadd.f32 %v2181_v31, %v3858_v45 }
 0x695   : > { %v2212_v40 = vadd.f32 %v2183_v62, %v3850_v13  ;;  %v2186_v7 = vpop.f32.mrb[44].mxu1 }
 0x696   : > { %2227 = vst [vmem:[%s4157_s20 + $0x40] sm:$0xff] %v2211_v9  ;;  %v2187_v11 = vadd.f32 %v2186_v7, %v2083_v16  ;;  %v2188_v43 = vpop.f32.mrb[45].mxu1 }
 0x697   : > { %2228 = vst [vmem:[%s4157_s20 + $0x48] sm:$0xff] %v2212_v40  ;;  %v2189_v8 = vadd.f32 %v2188_v43, %v4150_v46 }
 0x698   : > { %v2213_v5 = vadd.f32 %v2187_v11, %v3872_v25 }
 0x699   : > { %v2214_v32 = vadd.f32 %v2189_v8, %v3863_v22  ;;  %v2192_v53 = vpop.f32.mrb[46].mxu1 }
 0x69a   : > { %2229 = vst [vmem:[%s4157_s20 + $0x50] sm:$0xff] %v2213_v5  ;;  %v2193_v45 = vadd.f32 %v2192_v53, %v2083_v16  ;;  %v2194_v42 = vpop.f32.mrb[47].mxu1 }
 0x69b   : > { %2230 = vst [vmem:[%s4157_s20 + $0x58] sm:$0xff] %v2214_v32  ;;  %v2195_v13 = vadd.f32 %v2194_v42, %v4150_v46 }
 0x69c   : > { %v2215_v41 = vadd.f32 %v2193_v45, %v3886_v36 }
 0x69d   : > { %v2216_v10 = vadd.f32 %v2195_v13, %v3877_v33  ;;  %v2198_v56 = vpop.f32.mrb[48].mxu1 }
 0x69e   : > { %2231 = vst [vmem:[%s4157_s20 + $0x60] sm:$0xff] %v2215_v41  ;;  %v2199_v22 = vadd.f32 %v2198_v56, %v2083_v16  ;;  %v2200_v25 = vpop.f32.mrb[49].mxu1 }
 0x69f   : > { %2232 = vst [vmem:[%s4157_s20 + $0x68] sm:$0xff] %v2216_v10  ;;  %v2201_v23 = vadd.f32 %v2200_v25, %v4150_v46 }
 0x6a0   : > { %v2217_v14 = vadd.f32 %v2199_v22, %v3898_v54 }
 0x6a1   : > { %v2218_v33 = vadd.f32 %v2201_v23, %v3891_v49 }
 0x6a2   : > { %2233 = vst [vmem:[%s4157_s20 + $0x70] sm:$0xff] %v2217_v14 }
 0x6a3   : > { %2234 = vst [vmem:[%s4157_s20 + $0x78] sm:$0xff] %v2218_v33 }
 0x6a4   : > { %3291 = shalt.err (!%p3288_p4)
}
 0x6a5   : > { %s3292_s17 = scalar_lea.hbm %s4198_s26, 2048  ;;  %s3296_s27 = scalar_lea.hbm %s4255_s8, 4096 }
 0x6a6   : > { %p3293_p9 = scmp.ne.s32.totalorder %s4198_s26, %s3292_s17  ;;  %p3297_p8 = scmp.lt.u32.totalorder %s4198_s26, %s4255_s8 }
 0x6a7   : > { %p3298_p13 = scmp.lt.u32.totalorder %s3296_s27, %s3292_s17  ;;  %p3300_p10 = scmp.lt.u32.totalorder %s3292_s17, %s4198_s26 }
 0x6a8   : > { %p3294_p0 = pnand %p3293_p9, %p3558_p5 }
 0x6a9   : > { %p3299_p6 = por %p3298_p13, %p3297_p8 }
 0x6aa   : > { %p3295_p11 = pneg %p3294_p0 }
 0x6ab   : > { %p3301_p3 = por %p3300_p10, %p3299_p6 }
 0x6ad   : > { %p3302_p7 = pnand %p3301_p3, %p3295_p11 }
 0x6af   : > { %3305 = shalt.err (!%p3302_p7)
}
 0x6b0   : > { %s3363_s15 = smov 256   ;;  %s3364_s21 = smov 16  }
 0x6b1   : > { %3027 = dma.vmem_to_hbm [thread:$0]  (%p3558_p5), %s4200_s16, 2048, %s4198_s26, %s2236_s9, %s3363_s15, %s3363_s15, %s3364_s21  }
 0x6b2 PF: > { %s4285_s22 = sld [smem:[#allocation15_spill]]  ;;  %s4286_s1 = sld [smem:[#allocation16_spill]] }
 0x6b3   : > { %p4288_p1 = scmp.ge.s32.totalorder %s3352_s30, 2 }
 0x6b8   : > { %s2264_s11 = sand.u32 1, %s4285_s22   ;;  %p4287_p12 = scmp.ne.s32.totalorder %s4286_s1, 0 }
 0x6b9   : > { %s2265_s13 = scalar_lea.sflag [#allocation4], %s2264_s11 }
 0x6ba   : > { %p3044_p2 = pnand %p4288_p1, %p4287_p12 }
 0x6bc   : > { %3335 = dma.done.wait (!%p3044_p2), %s2265_s13, 2048  }
 0x6bd   : > { %3337 = vsyncadd (!%p3044_p2), %s2265_s13, 4294965248  ;;  %p23_p4 = scmp.ge.s32.totalorder %s3523_s25, 4   ;;  %s4289_s27 = smov %s3344_s28 }
 0x6be   : > { %s4290_s28 = smov %s3348_s29  ;;  %s4291_s29 = smov %s3554_s19 }
 0x6bf   : > { %s4292_s30 = smov %s3523_s25  ;;  %25 = sbr.rel (!%p23_p4) target bundleno = 9 (0x9), region = 109 }
 0x6c6   :  { %2270 = vsyncpa [#allocation3], 1 }
 0x6c7   :  { %2272 = vsyncpa [#allocation3 + $0x1], 1 }
 0x6c8   :  { %2273 = vsyncpa [#allocation6], 1 }
 0x6c9   :  { %2274 = vsyncpa [#allocation9], 1 }
 0x6ca   :  { %2275 = vsyncpa [#allocation4], 1 }
 0x6cb   :  { %2277 = vsyncpa [#allocation4 + $0x1], 1 }

</bundles_post_ra>
